<compile_context>
chip_gen: v6e
topology: v6e:2x2x1
jax: 0.10.0
libtpu: 0.0.40
codegen_flags: <defaults>
</compile_context>

<pallas_src>
import functools

import jax
import jax.numpy as jnp
from jax.experimental import pallas as pl
from jax.experimental.pallas import tpu as pltpu


TILE_B = 128        # batch tile (multiple of 8 sublanes / MXU rows)
IN_FEATURES = 784   # 28*28
K_PAD = 896         # 784 padded up to a multiple of 128 lanes
HIDDEN = 512


def encoder_kernel(x_ref, w1_ref, b1_ref, w23_ref, b23_ref, eps_ref,
                   z_ref, mu_ref, sigma_ref, kl_ref,
                   *, latent_dim, latent_pad, tile_b, batch):
    # x:   (TILE_B, K_PAD)  bf16      w1:  (K_PAD, 512)   bf16
    # b1:  (1, 512)         f32       w23: (512, 2*LP)    bf16  = [W2 | W3]
    # b23: (1, 2*LP)        f32       eps: (TILE_B, LP)   f32

    # ---- encoder1 + ReLU: bf16 MXU inputs, f32 accumulate; VPU math in f32 ----
    h = jnp.dot(x_ref[...], w1_ref[...],
                preferred_element_type=jnp.float32) + b1_ref[...]
    h = jnp.maximum(h, 0.0)

    # ---- fused encoder2 || encoder3: one MXU matmul, lane-aligned slices ----
    ms = jnp.dot(h.astype(jnp.bfloat16), w23_ref[...],
                 preferred_element_type=jnp.float32) + b23_ref[...]
    mu = ms[:, :latent_pad]
    s_pre = ms[:, latent_pad:]
    sigma = jnp.exp(s_pre)

    # ---- reparameterization: z = mu + sigma * eps ----
    z = mu + sigma * eps_ref[...]

    # ---- KL partial sums for this batch tile ----
    # log(sigma) == s_pre, so no exp->log round trip (and no inf for large s_pre).
    # Mask padded batch rows and padded latent columns out of the sum.
    row = (pl.program_id(0) * tile_b
           + jax.lax.broadcasted_iota(jnp.int32, (tile_b, latent_pad), 0))
    col = jax.lax.broadcasted_iota(jnp.int32, (tile_b, latent_pad), 1)
    valid = (row < batch) & (col < latent_dim)
    kl_terms = sigma * sigma + mu * mu - s_pre - 0.5
    kl_terms = jnp.where(valid, kl_terms, 0.0)
    # Lane-dense (1, LP) per-tile partial; final scalar reduce happens in the wrapper.
    kl_ref[...] = jnp.sum(kl_terms, axis=0, keepdims=True)

    z_ref[...] = z
    mu_ref[...] = mu
    sigma_ref[...] = sigma


def encoder_forward(x_img, params, eps):
    """x_img: (B, 1, 28, 28) NCHW.  Returns (z, mu, sigma, kl)."""
    w1, b1, w2, b2, w3, b3 = params
    B = x_img.shape[0]
    L = w2.shape[1]
    LP = ((L + 127) // 128) * 128                   # lane-dense latent width
    B_pad = ((B + TILE_B - 1) // TILE_B) * TILE_B   # multiple of the batch tile
    num_tiles = B_pad // TILE_B

    x = x_img.reshape(B, -1)                        # torch.flatten(x, start_dim=1)

    # Pad batch -> B_pad and features 784 -> 896; cast MXU operands to bf16.
    x_p = jnp.zeros((B_pad, K_PAD), jnp.float32).at[:B, :IN_FEATURES].set(x)
    x_p = x_p.astype(jnp.bfloat16)
    w1_p = jnp.zeros((K_PAD, HIDDEN), jnp.float32).at[:IN_FEATURES, :].set(w1)
    w1_p = w1_p.astype(jnp.bfloat16)

    # Fuse encoder2 / encoder3 into one (512, 2*LP) weight (zero-padded latent).
    w23 = (jnp.zeros((HIDDEN, 2 * LP), jnp.float32)
           .at[:, :L].set(w2).at[:, LP:LP + L].set(w3)).astype(jnp.bfloat16)
    b23 = (jnp.zeros((1, 2 * LP), jnp.float32)
           .at[:, :L].set(b2).at[:, LP:LP + L].set(b3))

    eps_p = jnp.zeros((B_pad, LP), jnp.float32).at[:B, :L].set(eps)

    kernel = functools.partial(
        encoder_kernel, latent_dim=L, latent_pad=LP, tile_b=TILE_B, batch=B)

    z_p, mu_p, sigma_p, kl_part = pl.pallas_call(
        kernel,
        grid=(num_tiles,),
        in_specs=[
            pl.BlockSpec((TILE_B, K_PAD), lambda i: (i, 0)),    # x: tiled on batch
            pl.BlockSpec((K_PAD, HIDDEN), lambda i: (0, 0)),    # W1: resident
            pl.BlockSpec((1, HIDDEN), lambda i: (0, 0)),        # b1: resident
            pl.BlockSpec((HIDDEN, 2 * LP), lambda i: (0, 0)),   # W2||W3: resident
            pl.BlockSpec((1, 2 * LP), lambda i: (0, 0)),        # b2||b3: resident
            pl.BlockSpec((TILE_B, LP), lambda i: (i, 0)),       # eps: tiled on batch
        ],
        out_specs=(
            pl.BlockSpec((TILE_B, LP), lambda i: (i, 0)),       # z
            pl.BlockSpec((TILE_B, LP), lambda i: (i, 0)),       # mu
            pl.BlockSpec((TILE_B, LP), lambda i: (i, 0)),       # sigma
            pl.BlockSpec((1, LP), lambda i: (i, 0)),            # per-tile KL partials
        ),
        out_shape=(
            jax.ShapeDtypeStruct((B_pad, LP), jnp.float32),
            jax.ShapeDtypeStruct((B_pad, LP), jnp.float32),
            jax.ShapeDtypeStruct((B_pad, LP), jnp.float32),
            jax.ShapeDtypeStruct((num_tiles, LP), jnp.float32),
        ),
        compiler_params=pltpu.CompilerParams(
            dimension_semantics=("parallel",)),   # shards batch tiles over v7x's 2 TCs
    )(x_p, w1_p, b1, w23, b23, eps_p)

    z = z_p[:B, :L]
    mu = mu_p[:B, :L]
    sigma = sigma_p[:B, :L]
    kl = jnp.sum(kl_part)
    return z, mu, sigma, kl


def init_params(key, latent_dim):
    """Deterministic synthetic init matching nn.Linear shapes (stored as (in, out))."""
    k1, k2, k3, k4, k5, k6 = jax.random.split(key, 6)

    def linear(kw, kb, fan_in, fan_out):
        bound = 1.0 / jnp.sqrt(fan_in)
        w = jax.random.uniform(kw, (fan_in, fan_out), jnp.float32, -bound, bound)
        b = jax.random.uniform(kb, (1, fan_out), jnp.float32, -bound, bound)
        return w, b

    w1, b1 = linear(k1, k2, IN_FEATURES, HIDDEN)      # encoder1
    w2, b2 = linear(k3, k4, HIDDEN, latent_dim)       # encoder2 (mu)
    w3, b3 = linear(k5, k6, HIDDEN, latent_dim)       # encoder3 (log sigma)
    return (w1, b1, w2, b2, w3, b3)


if __name__ == "__main__":
    key = jax.random.PRNGKey(0)
    k_x, k_p, k_eps = jax.random.split(key, 3)

    B = 4
    latent_dim = 32

    # MNIST-shaped NCHW input (B, 1, 28, 28); 28*28 = 784 as the module requires.
    x_img = jax.random.normal(k_x, (B, 1, 28, 28), dtype=jnp.float32)
    params = init_params(k_p, latent_dim)
    # eps plays the role of self.N.sample(mu.shape) — drawn deterministically here.
    eps = jax.random.normal(k_eps, (B, latent_dim), dtype=jnp.float32)

    fwd = jax.jit(encoder_forward)
    z, mu, sigma, kl = jax.block_until_ready(fwd(x_img, params, eps))

    # Pure-JAX reference using the same bf16-MXU / f32-accumulate scheme.
    xf = x_img.reshape(B, -1)
    w1, b1, w2, b2, w3, b3 = params
    bf = jnp.bfloat16
    h_ref = jnp.maximum(
        jnp.dot(xf.astype(bf), w1.astype(bf),
                preferred_element_type=jnp.float32) + b1, 0.0)
    mu_ref = jnp.dot(h_ref.astype(bf), w2.astype(bf),
                     preferred_element_type=jnp.float32) + b2
    s_pre_ref = jnp.dot(h_ref.astype(bf), w3.astype(bf),
                        preferred_element_type=jnp.float32) + b3
    sigma_ref = jnp.exp(s_pre_ref)
    z_ref = mu_ref + sigma_ref * eps
    kl_ref = jnp.sum(sigma_ref ** 2 + mu_ref ** 2 - s_pre_ref - 0.5)

    assert jnp.allclose(mu, mu_ref, atol=2e-3, rtol=2e-3)
    assert jnp.allclose(sigma, sigma_ref, atol=2e-3, rtol=2e-3)
    assert jnp.allclose(z, z_ref, atol=2e-3, rtol=2e-3)
    assert jnp.allclose(kl, kl_ref, atol=5e-2, rtol=2e-3)

    print("KERNEL_OK")
</pallas_src>

<mosaic_0001>
module attributes {stable_mosaic.version = 11 : i64} {
  func.func @encoder_kernel(%arg0: i32, %arg1: memref<128x896xbf16, #tpu.memory_space<vmem>>, %arg2: memref<896x512xbf16, #tpu.memory_space<vmem>>, %arg3: memref<1x512xf32, #tpu.memory_space<vmem>>, %arg4: memref<512x256xbf16, #tpu.memory_space<vmem>>, %arg5: memref<1x256xf32, #tpu.memory_space<vmem>>, %arg6: memref<128x128xf32, #tpu.memory_space<vmem>>, %arg7: memref<128x128xf32, #tpu.memory_space<vmem>>, %arg8: memref<128x128xf32, #tpu.memory_space<vmem>>, %arg9: memref<128x128xf32, #tpu.memory_space<vmem>>, %arg10: memref<1x128xf32, #tpu.memory_space<vmem>>) attributes {dimension_semantics = [#tpu.dimension_semantics<parallel>], iteration_bounds = array<i64: 1>, scalar_prefetch = 0 : i64, scratch_operands = 0 : i64, tpu.core_type = #tpu.core_type<tc>, window_params = [{transform_indices = @transform_0, window_bounds = array<i64: 128, 896>}, {pipeline_mode = #tpu.pipeline_mode<synchronous>, transform_indices = @transform_1, window_bounds = array<i64: 896, 512>}, {pipeline_mode = #tpu.pipeline_mode<synchronous>, transform_indices = @transform_2, window_bounds = array<i64: 1, 512>}, {pipeline_mode = #tpu.pipeline_mode<synchronous>, transform_indices = @transform_3, window_bounds = array<i64: 512, 256>}, {pipeline_mode = #tpu.pipeline_mode<synchronous>, transform_indices = @transform_4, window_bounds = array<i64: 1, 256>}, {transform_indices = @transform_5, window_bounds = array<i64: 128, 128>}, {transform_indices = @transform_6, window_bounds = array<i64: 128, 128>}, {transform_indices = @transform_7, window_bounds = array<i64: 128, 128>}, {transform_indices = @transform_8, window_bounds = array<i64: 128, 128>}, {transform_indices = @transform_9, window_bounds = array<i64: 1, 128>}]} {
    %c0 = arith.constant 0 : index
    %c0_0 = arith.constant 0 : index
    %0 = vector.load %arg1[%c0, %c0_0] : memref<128x896xbf16, #tpu.memory_space<vmem>>, vector<128x896xbf16>
    %c0_1 = arith.constant 0 : index
    %c0_2 = arith.constant 0 : index
    %1 = vector.load %arg2[%c0_1, %c0_2] : memref<896x512xbf16, #tpu.memory_space<vmem>>, vector<896x512xbf16>
    %cst = arith.constant dense<0.000000e+00> : vector<128x512xf32>
    %2 = tpu.matmul %0, %1, %cst {dimension_numbers = #tpu.dot_dimension_numbers<[1], [0], [0], [1], [0, 0, 1, 1], [], []>} : vector<128x896xbf16>, vector<896x512xbf16>, vector<128x512xf32> -> vector<128x512xf32>
    %c0_3 = arith.constant 0 : index
    %c0_4 = arith.constant 0 : index
    %3 = vector.load %arg3[%c0_3, %c0_4] : memref<1x512xf32, #tpu.memory_space<vmem>>, vector<1x512xf32>
    %4 = vector.broadcast %3 : vector<1x512xf32> to vector<128x512xf32>
    %5 = arith.addf %2, %4 : vector<128x512xf32>
    %cst_5 = arith.constant 0.000000e+00 : f32
    %6 = vector.broadcast %cst_5 : f32 to vector<128x512xf32>
    %7 = arith.maximumf %5, %6 : vector<128x512xf32>
    %8 = arith.truncf %7 : vector<128x512xf32> to vector<128x512xbf16>
    %c0_6 = arith.constant 0 : index
    %c0_7 = arith.constant 0 : index
    %9 = vector.load %arg4[%c0_6, %c0_7] : memref<512x256xbf16, #tpu.memory_space<vmem>>, vector<512x256xbf16>
    %cst_8 = arith.constant dense<0.000000e+00> : vector<128x256xf32>
    %10 = tpu.matmul %8, %9, %cst_8 {dimension_numbers = #tpu.dot_dimension_numbers<[1], [0], [0], [1], [0, 0, 1, 1], [], []>} : vector<128x512xbf16>, vector<512x256xbf16>, vector<128x256xf32> -> vector<128x256xf32>
    %c0_9 = arith.constant 0 : index
    %c0_10 = arith.constant 0 : index
    %11 = vector.load %arg5[%c0_9, %c0_10] : memref<1x256xf32, #tpu.memory_space<vmem>>, vector<1x256xf32>
    %12 = vector.broadcast %11 : vector<1x256xf32> to vector<128x256xf32>
    %13 = arith.addf %10, %12 : vector<128x256xf32>
    %14 = vector.extract_strided_slice %13 {offsets = [0, 0], sizes = [128, 128], strides = [1, 1]} : vector<128x256xf32> to vector<128x128xf32>
    %15 = vector.extract_strided_slice %13 {offsets = [0, 128], sizes = [128, 128], strides = [1, 1]} : vector<128x256xf32> to vector<128x128xf32>
    %16 = math.exp %15 : vector<128x128xf32>
    %c0_11 = arith.constant 0 : index
    %c0_12 = arith.constant 0 : index
    %17 = vector.load %arg6[%c0_11, %c0_12] : memref<128x128xf32, #tpu.memory_space<vmem>>, vector<128x128xf32>
    %18 = arith.mulf %16, %17 : vector<128x128xf32>
    %19 = arith.addf %14, %18 : vector<128x128xf32>
    %c128_i32 = arith.constant 128 : i32
    %20 = arith.muli %arg0, %c128_i32 : i32
    %21 = tpu.iota {dimensions = array<i32: 0>} : vector<128x128xi32>
    %22 = vector.broadcast %20 : i32 to vector<128x128xi32>
    %23 = arith.addi %22, %21 : vector<128x128xi32>
    %24 = tpu.iota {dimensions = array<i32: 1>} : vector<128x128xi32>
    %c4_i32 = arith.constant 4 : i32
    %25 = vector.broadcast %c4_i32 : i32 to vector<128x128xi32>
    %26 = arith.cmpi slt, %23, %25 : vector<128x128xi32>
    %c32_i32 = arith.constant 32 : i32
    %27 = vector.broadcast %c32_i32 : i32 to vector<128x128xi32>
    %28 = arith.cmpi slt, %24, %27 : vector<128x128xi32>
    %29 = arith.andi %26, %28 : vector<128x128xi1>
    %30 = arith.mulf %16, %16 : vector<128x128xf32>
    %31 = arith.mulf %14, %14 : vector<128x128xf32>
    %32 = arith.addf %30, %31 : vector<128x128xf32>
    %33 = arith.subf %32, %15 : vector<128x128xf32>
    %cst_13 = arith.constant 5.000000e-01 : f32
    %34 = vector.broadcast %cst_13 : f32 to vector<128x128xf32>
    %35 = arith.subf %33, %34 : vector<128x128xf32>
    %cst_14 = arith.constant 0.000000e+00 : f32
    %36 = vector.broadcast %cst_14 : f32 to vector<128x128xf32>
    %37 = arith.select %29, %35, %36 : vector<128x128xi1>, vector<128x128xf32>
    %cst_15 = arith.constant dense<0.000000e+00> : vector<128xf32>
    %38 = vector.multi_reduction <add>, %37, %cst_15 [0] : vector<128x128xf32> to vector<128xf32>
    %39 = vector.shape_cast %38 : vector<128xf32> to vector<1x128xf32>
    %c0_16 = arith.constant 0 : index
    %c0_17 = arith.constant 0 : index
    %40 = vector.load %arg10[%c0_16, %c0_17] : memref<1x128xf32, #tpu.memory_space<vmem>>, vector<1x128xf32>
    tpu.vector_store %arg10[%c0_16, %c0_17], %39 {strides = array<i32>} : memref<1x128xf32, #tpu.memory_space<vmem>>, vector<1x128xf32>,
    %c0_18 = arith.constant 0 : index
    %c0_19 = arith.constant 0 : index
    %41 = vector.load %arg7[%c0_18, %c0_19] : memref<128x128xf32, #tpu.memory_space<vmem>>, vector<128x128xf32>
    tpu.vector_store %arg7[%c0_18, %c0_19], %19 {strides = array<i32>} : memref<128x128xf32, #tpu.memory_space<vmem>>, vector<128x128xf32>,
    %c0_20 = arith.constant 0 : index
    %c0_21 = arith.constant 0 : index
    %42 = vector.load %arg8[%c0_20, %c0_21] : memref<128x128xf32, #tpu.memory_space<vmem>>, vector<128x128xf32>
    tpu.vector_store %arg8[%c0_20, %c0_21], %14 {strides = array<i32>} : memref<128x128xf32, #tpu.memory_space<vmem>>, vector<128x128xf32>,
    %c0_22 = arith.constant 0 : index
    %c0_23 = arith.constant 0 : index
    %43 = vector.load %arg9[%c0_22, %c0_23] : memref<128x128xf32, #tpu.memory_space<vmem>>, vector<128x128xf32>
    tpu.vector_store %arg9[%c0_22, %c0_23], %16 {strides = array<i32>} : memref<128x128xf32, #tpu.memory_space<vmem>>, vector<128x128xf32>,
    return
  }
  func.func @transform_0(%arg0: i32) -> (i32, i32) {
    %c0_i32 = arith.constant 0 : i32
    %c0_i32_0 = arith.constant 0 : i32
    return %arg0, %c0_i32 : i32, i32
  }
  func.func @transform_1(%arg0: i32) -> (i32, i32) {
    %c0_i32 = arith.constant 0 : i32
    %c0_i32_0 = arith.constant 0 : i32
    %c0_i32_1 = arith.constant 0 : i32
    return %c0_i32, %c0_i32_0 : i32, i32
  }
  func.func @transform_2(%arg0: i32) -> (i32, i32) {
    %c0_i32 = arith.constant 0 : i32
    %c0_i32_0 = arith.constant 0 : i32
    %c0_i32_1 = arith.constant 0 : i32
    return %c0_i32, %c0_i32_0 : i32, i32
  }
  func.func @transform_3(%arg0: i32) -> (i32, i32) {
    %c0_i32 = arith.constant 0 : i32
    %c0_i32_0 = arith.constant 0 : i32
    %c0_i32_1 = arith.constant 0 : i32
    return %c0_i32, %c0_i32_0 : i32, i32
  }
  func.func @transform_4(%arg0: i32) -> (i32, i32) {
    %c0_i32 = arith.constant 0 : i32
    %c0_i32_0 = arith.constant 0 : i32
    %c0_i32_1 = arith.constant 0 : i32
    return %c0_i32, %c0_i32_0 : i32, i32
  }
  func.func @transform_5(%arg0: i32) -> (i32, i32) {
    %c0_i32 = arith.constant 0 : i32
    %c0_i32_0 = arith.constant 0 : i32
    return %arg0, %c0_i32 : i32, i32
  }
  func.func @transform_6(%arg0: i32) -> (i32, i32) {
    %c0_i32 = arith.constant 0 : i32
    %c0_i32_0 = arith.constant 0 : i32
    return %arg0, %c0_i32 : i32, i32
  }
  func.func @transform_7(%arg0: i32) -> (i32, i32) {
    %c0_i32 = arith.constant 0 : i32
    %c0_i32_0 = arith.constant 0 : i32
    return %arg0, %c0_i32 : i32, i32
  }
  func.func @transform_8(%arg0: i32) -> (i32, i32) {
    %c0_i32 = arith.constant 0 : i32
    %c0_i32_0 = arith.constant 0 : i32
    return %arg0, %c0_i32 : i32, i32
  }
  func.func @transform_9(%arg0: i32) -> (i32, i32) {
    %c0_i32 = arith.constant 0 : i32
    %c0_i32_0 = arith.constant 0 : i32
    return %arg0, %c0_i32 : i32, i32
  }
}

</mosaic_0001>

<bundles_post_ra>
// kernel: encoder_forward.1
= control target key start
LH: loop header
LB: loop body
LE: loop exit
PB: predicated region body
PF: predicated region fallthrough
CT: control target
= control target key end

     0   :  { %s6654_s1 = inlined_call_operand.vmem [shape: bf16[896,512], index: 1, kind: input, shape index: {}]   ;;  %s6655_s0 = inlined_call_operand.vmem [shape: bf16[128,896], index: 0, kind: input, shape index: {}]   ;;  %s6656_s3 = inlined_call_operand.vmem [shape: bf16[512,256], index: 3, kind: input, shape index: {}]   ;;  %s6657_s2 = inlined_call_operand.vmem [shape: f32[1,512], index: 2, kind: input, shape index: {}]   ;;  %s6658_s4 = inlined_call_operand.vmem [shape: f32[1,256], index: 4, kind: input, shape index: {}]   ;;  %s6659_s7 = inlined_call_operand.vmem [shape: f32[128,128], index: 7, kind: output, shape index: {1}]   ;;  %s6660_s5 = inlined_call_operand.vmem [shape: f32[128,128], index: 5, kind: input, shape index: {}]   ;;  %s6661_s8 = inlined_call_operand.vmem [shape: f32[128,128], index: 8, kind: output, shape index: {2}]   ;;  %s6662_s6 = inlined_call_operand.vmem [shape: f32[128,128], index: 6, kind: output, shape index: {0}]   ;;  %s6663_s9 = inlined_call_operand.vmem [shape: f32[1,128], index: 9, kind: output, shape index: {3}]  }
   0x1   :  { %v4061_v0 = vld [vmem:[%s6654_s1 + $0xe4] ss:$16 sps:$4 sm:$0xff]   ;;  %v4065_v2 = vld [vmem:[%s6654_s1 + $0xe0] ss:$16 sps:$4 sm:$0xff]   ;;  %v4162_v51 = vld [vmem:[%s6655_s0 + $0xc] ss:$28 sps:$4 sm:$0xff]  }
   0x2   :  { %v4063_v1 = vld [vmem:[%s6654_s1 + $0x2e4] ss:$16 sps:$4 sm:$0xff]   ;;  %1746 = vmatprep.subr.bf16.mxu0 %v4061_v0  ;;  %v4066_v3 = vld [vmem:[%s6654_s1 + $0x2e0] ss:$16 sps:$4 sm:$0xff]   ;;  %1891 = vmatprep.mubr.bf16.mxu1 %v4162_v51 }
   0x3   :  { %1859 = vmatprep.subr.bf16.mxu1 %v4063_v1  ;;  %v4067_v4 = vld [vmem:[%s6654_s1 + $0xc4] ss:$16 sps:$4 sm:$0xff]   ;;  %1747 = vmatpush1.bf16.msra.mxu0 %v4065_v2  ;;  %v4071_v6 = vld [vmem:[%s6654_s1 + $0xc0] ss:$16 sps:$4 sm:$0xff]  }
   0x4   :  { %1860 = vmatpush1.bf16.msra.mxu1 %v4066_v3  ;;  %v4069_v5 = vld [vmem:[%s6654_s1 + $0x2c4] ss:$16 sps:$4 sm:$0xff]   ;;  %1748 = vmatprep.subr.bf16.mxu0 %v4067_v4  ;;  %v4072_v7 = vld [vmem:[%s6654_s1 + $0x2c0] ss:$16 sps:$4 sm:$0xff]  }
   0x5   :  { %1861 = vmatprep.subr.bf16.mxu1 %v4069_v5  ;;  %v4073_v8 = vld [vmem:[%s6654_s1 + $0xa4] ss:$16 sps:$4 sm:$0xff]   ;;  %v4077_v10 = vld [vmem:[%s6654_s1 + $0xa0] ss:$16 sps:$4 sm:$0xff]  }
   0x6   :  { %v4075_v9 = vld [vmem:[%s6654_s1 + $0x2a4] ss:$16 sps:$4 sm:$0xff]   ;;  %v4078_v11 = vld [vmem:[%s6654_s1 + $0x2a0] ss:$16 sps:$4 sm:$0xff]  }
   0x7   :  { %1749 = vmatpush1.bf16.msra.mxu0 %v4071_v6  ;;  %v4079_v12 = vld [vmem:[%s6654_s1 + $0x84] ss:$16 sps:$4 sm:$0xff]   ;;  %v4083_v14 = vld [vmem:[%s6654_s1 + $0x80] ss:$16 sps:$4 sm:$0xff]  }
   0x8   :  { %1862 = vmatpush1.bf16.msra.mxu1 %v4072_v7  ;;  %1750 = vmatprep.subr.bf16.mxu0 %v4073_v8  ;;  %v4081_v13 = vld [vmem:[%s6654_s1 + $0x284] ss:$16 sps:$4 sm:$0xff]   ;;  %v4084_v15 = vld [vmem:[%s6654_s1 + $0x280] ss:$16 sps:$4 sm:$0xff]  }
   0x9   :  { %1863 = vmatprep.subr.bf16.mxu1 %v4075_v9  ;;  %v4085_v16 = vld [vmem:[%s6654_s1 + $0x64] ss:$16 sps:$4 sm:$0xff]   ;;  %v4089_v18 = vld [vmem:[%s6654_s1 + $0x60] ss:$16 sps:$4 sm:$0xff]   ;;  %v4172_v9 = vld [vmem:[%s6655_s0 + $0x3c] ss:$28 sps:$4 sm:$0xff]  }
   0xa   :  { %v4087_v17 = vld [vmem:[%s6654_s1 + $0x264] ss:$16 sps:$4 sm:$0xff]   ;;  %v4090_v19 = vld [vmem:[%s6654_s1 + $0x260] ss:$16 sps:$4 sm:$0xff]  }
   0xb   :  { %1751 = vmatpush1.bf16.msra.mxu0 %v4077_v10  ;;  %v4091_v20 = vld [vmem:[%s6654_s1 + $0x44] ss:$16 sps:$4 sm:$0xff]   ;;  %v4095_v22 = vld [vmem:[%s6654_s1 + $0x40] ss:$16 sps:$4 sm:$0xff]  }
   0xc   :  { %1864 = vmatpush1.bf16.msra.mxu1 %v4078_v11  ;;  %1752 = vmatprep.subr.bf16.mxu0 %v4079_v12  ;;  %v4093_v21 = vld [vmem:[%s6654_s1 + $0x244] ss:$16 sps:$4 sm:$0xff]   ;;  %v4096_v23 = vld [vmem:[%s6654_s1 + $0x240] ss:$16 sps:$4 sm:$0xff]  }
   0xd   :  { %1865 = vmatprep.subr.bf16.mxu1 %v4081_v13  ;;  %v4097_v24 = vld [vmem:[%s6654_s1 + $0x24] ss:$16 sps:$4 sm:$0xff]   ;;  %v4101_v26 = vld [vmem:[%s6654_s1 + $0x20] ss:$16 sps:$4 sm:$0xff]  }
   0xe   :  { %v4099_v25 = vld [vmem:[%s6654_s1 + $0x224] ss:$16 sps:$4 sm:$0xff]   ;;  %v4102_v27 = vld [vmem:[%s6654_s1 + $0x220] ss:$16 sps:$4 sm:$0xff]  }
   0xf   :  { %1753 = vmatpush1.bf16.msra.mxu0 %v4083_v14  ;;  %v4103_v28 = vld [vmem:[%s6654_s1 + $0x4] ss:$16 sps:$4 sm:$0xff]   ;;  %v4107_v30 = vld [vmem:[%s6654_s1] ss:$16 sps:$4 sm:$0xff]  }
  0x10   :  { %1866 = vmatpush1.bf16.msra.mxu1 %v4084_v15  ;;  %1754 = vmatprep.subr.bf16.mxu0 %v4085_v16  ;;  %v4105_v29 = vld [vmem:[%s6654_s1 + $0x204] ss:$16 sps:$4 sm:$0xff]   ;;  %v4108_v31 = vld [vmem:[%s6654_s1 + $0x200] ss:$16 sps:$4 sm:$0xff]  }
  0x11   :  { %1867 = vmatprep.subr.bf16.mxu1 %v4087_v17  ;;  %v4109_v32 = vld [vmem:[%s6654_s1 + $0x1e4] ss:$16 sps:$4 sm:$0xff]   ;;  %v4113_v34 = vld [vmem:[%s6654_s1 + $0x1e0] ss:$16 sps:$4 sm:$0xff]  }
  0x12   :  { %v4111_v33 = vld [vmem:[%s6654_s1 + $0x3e4] ss:$16 sps:$4 sm:$0xff]   ;;  %v4114_v35 = vld [vmem:[%s6654_s1 + $0x3e0] ss:$16 sps:$4 sm:$0xff]  }
  0x13   :  { %1755 = vmatpush1.bf16.msra.mxu0 %v4089_v18  ;;  %v4115_v36 = vld [vmem:[%s6654_s1 + $0x1c4] ss:$16 sps:$4 sm:$0xff]   ;;  %v4119_v38 = vld [vmem:[%s6654_s1 + $0x1c0] ss:$16 sps:$4 sm:$0xff]  }
  0x14   :  { %1868 = vmatpush1.bf16.msra.mxu1 %v4090_v19  ;;  %1756 = vmatprep.subr.bf16.mxu0 %v4091_v20  ;;  %v4117_v37 = vld [vmem:[%s6654_s1 + $0x3c4] ss:$16 sps:$4 sm:$0xff]   ;;  %v4120_v39 = vld [vmem:[%s6654_s1 + $0x3c0] ss:$16 sps:$4 sm:$0xff]  }
  0x15   :  { %1869 = vmatprep.subr.bf16.mxu1 %v4093_v21  ;;  %v4121_v40 = vld [vmem:[%s6654_s1 + $0x1a4] ss:$16 sps:$4 sm:$0xff]   ;;  %v4125_v42 = vld [vmem:[%s6654_s1 + $0x1a0] ss:$16 sps:$4 sm:$0xff]   ;;  %v4189_v21 = vld [vmem:[%s6655_s0 + $0x7c] ss:$28 sps:$4 sm:$0xff]  }
  0x16   :  { %v4123_v41 = vld [vmem:[%s6654_s1 + $0x3a4] ss:$16 sps:$4 sm:$0xff]   ;;  %v4126_v43 = vld [vmem:[%s6654_s1 + $0x3a0] ss:$16 sps:$4 sm:$0xff]  }
  0x17   :  { %1757 = vmatpush1.bf16.msra.mxu0 %v4095_v22  ;;  %v4127_v44 = vld [vmem:[%s6654_s1 + $0x184] ss:$16 sps:$4 sm:$0xff]   ;;  %v4131_v46 = vld [vmem:[%s6654_s1 + $0x180] ss:$16 sps:$4 sm:$0xff]  }
  0x18   :  { %1870 = vmatpush1.bf16.msra.mxu1 %v4096_v23  ;;  %1758 = vmatprep.subr.bf16.mxu0 %v4097_v24  ;;  %v4129_v45 = vld [vmem:[%s6654_s1 + $0x384] ss:$16 sps:$4 sm:$0xff]   ;;  %v4132_v47 = vld [vmem:[%s6654_s1 + $0x380] ss:$16 sps:$4 sm:$0xff]  }
  0x19   :  { %1871 = vmatprep.subr.bf16.mxu1 %v4099_v25  ;;  %v4133_v48 = vld [vmem:[%s6654_s1 + $0x164] ss:$16 sps:$4 sm:$0xff]   ;;  %v4137_v52 = vld [vmem:[%s6654_s1 + $0x160] ss:$16 sps:$4 sm:$0xff]  }
  0x1a   :  { %v4159_v49 = vld [vmem:[%s6655_s0 + $0x4] ss:$28 sps:$4 sm:$0xff]   ;;  %v4176_v16 = vld [vmem:[%s6655_s0 + $0x38] ss:$28 sps:$4 sm:$0xff]   ;;  %v4191_v25 = vld [vmem:[%s6655_s0 + $0x70] ss:$28 sps:$4 sm:$0xff]  }
  0x1b   :  { %1759 = vmatpush1.bf16.msra.mxu0 %v4101_v26  ;;  %v4135_v50 = vld [vmem:[%s6654_s1 + $0x364] ss:$16 sps:$4 sm:$0xff]   ;;  %1778 = vmatprep.mubr.bf16.mxu0 %v4159_v49  ;;  %v4138_v53 = vld [vmem:[%s6654_s1 + $0x360] ss:$16 sps:$4 sm:$0xff]  }
  0x1c   :  { %1872 = vmatpush1.bf16.msra.mxu1 %v4102_v27  ;;  %1760 = vmatprep.subr.bf16.mxu0 %v4103_v28  ;;  %v4139_v54 = vld [vmem:[%s6654_s1 + $0x144] ss:$16 sps:$4 sm:$0xff]   ;;  %v4143_v56 = vld [vmem:[%s6654_s1 + $0x140] ss:$16 sps:$4 sm:$0xff]  }
  0x1d   :  { %1873 = vmatprep.subr.bf16.mxu1 %v4105_v29  ;;  %v4141_v55 = vld [vmem:[%s6654_s1 + $0x344] ss:$16 sps:$4 sm:$0xff]   ;;  %v4144_v57 = vld [vmem:[%s6654_s1 + $0x340] ss:$16 sps:$4 sm:$0xff]  }
  0x1e   :  { %v4145_v58 = vld [vmem:[%s6654_s1 + $0x124] ss:$16 sps:$4 sm:$0xff]   ;;  %v4149_v60 = vld [vmem:[%s6654_s1 + $0x120] ss:$16 sps:$4 sm:$0xff]  }
  0x1f   :  { %1761 = vmatpush1.bf16.msra.mxu0 %v4107_v30  ;;  %v4147_v59 = vld [vmem:[%s6654_s1 + $0x324] ss:$16 sps:$4 sm:$0xff]   ;;  %v4150_v61 = vld [vmem:[%s6654_s1 + $0x320] ss:$16 sps:$4 sm:$0xff]  }
  0x20   :  { %1874 = vmatpush1.bf16.msra.mxu1 %v4108_v31  ;;  %1762 = vmatprep.subr.bf16.mxu0 %v4109_v32  ;;  %v4151_v62 = vld [vmem:[%s6654_s1 + $0x104] ss:$16 sps:$4 sm:$0xff]   ;;  %v4155_v0 = vld [vmem:[%s6654_s1 + $0x100] ss:$16 sps:$4 sm:$0xff]   ;;  %v4202_v31 = vld [vmem:[%s6655_s0 + $0xac] ss:$28 sps:$4 sm:$0xff]  }
  0x21   :  { %1875 = vmatprep.subr.bf16.mxu1 %v4111_v33  ;;  %v4153_v63 = vld [vmem:[%s6654_s1 + $0x304] ss:$16 sps:$4 sm:$0xff]   ;;  %v4156_v1 = vld [vmem:[%s6654_s1 + $0x300] ss:$16 sps:$4 sm:$0xff]  }
  0x22   :  { %v4165_v2 = vld [vmem:[%s6654_s1 + $0x4e4] ss:$16 sps:$4 sm:$0xff]   ;;  %v4157_v4 = vld [vmem:[%s6655_s0] ss:$28 sps:$4 sm:$0xff]  }
  0x23   :  { %1763 = vmatpush2.bf16.msra.mxu0 %v4113_v34  ;;  %v4168_v3 = vld [vmem:[%s6654_s1 + $0x6e4] ss:$16 sps:$4 sm:$0xff]   ;;  %v4163_v6 = vld [vmem:[%s6654_s1 + $0x4e0] ss:$16 sps:$4 sm:$0xff]  }
  0x24   :  { %1876 = vmatpush2.bf16.msra.mxu1 %v4114_v35  ;;  %1764 = vmatprep.subr.bf16.mxu0 %v4115_v36  ;;  %v4160_v5 = vld [vmem:[%s6655_s0 + $0x8] ss:$28 sps:$4 sm:$0xff]   ;;  %v4166_v7 = vld [vmem:[%s6654_s1 + $0x6e0] ss:$16 sps:$4 sm:$0xff]   ;;  %v4192_v27 = vld [vmem:[%s6655_s0 + $0x78] ss:$28 sps:$4 sm:$0xff]  }
  0x25   :  { %1877 = vmatprep.subr.bf16.mxu1 %v4117_v37  ;;  %v4171_v8 = vld [vmem:[%s6654_s1 + $0x4c4] ss:$16 sps:$4 sm:$0xff]   ;;  %v4169_v12 = vld [vmem:[%s6654_s1 + $0x4c0] ss:$16 sps:$4 sm:$0xff]  }
  0x26   :  { %v4174_v10 = vld [vmem:[%s6655_s0 + $0x44] ss:$28 sps:$4 sm:$0xff]   ;;  %v4187_v20 = vld [vmem:[%s6655_s0 + $0x74] ss:$28 sps:$4 sm:$0xff]  }
  0x27   :  { %1765 = vmatpush2.bf16.msra.mxu0 %v4119_v38  ;;  %v4183_v11 = vld [vmem:[%s6654_s1 + $0x6c4] ss:$16 sps:$4 sm:$0xff]   ;;  %v4181_v14 = vld [vmem:[%s6654_s1 + $0x6c0] ss:$16 sps:$4 sm:$0xff]  }
  0x28   :  { %1878 = vmatpush2.bf16.msra.mxu1 %v4120_v39  ;;  %1766 = vmatprep.subr.bf16.mxu0 %v4121_v40  ;;  %v4180_v13 = vld [vmem:[%s6654_s1 + $0x4a4] ss:$16 sps:$4 sm:$0xff]   ;;  %v4177_v17 = vld [vmem:[%s6655_s0 + $0x40] ss:$28 sps:$4 sm:$0xff]   ;;  %v4207_v39 = vld [vmem:[%s6655_s0 + $0xb0] ss:$28 sps:$4 sm:$0xff]  }
  0x29   :  { %1879 = vmatprep.subr.bf16.mxu1 %v4123_v41  ;;  %v4198_v15 = vld [vmem:[%s6654_s1 + $0x6a4] ss:$16 sps:$4 sm:$0xff]   ;;  %v4178_v18 = vld [vmem:[%s6654_s1 + $0x4a0] ss:$16 sps:$4 sm:$0xff]  }
  0x2a   :  { %v4186_v19 = vld [vmem:[%s6654_s1 + $0x484] ss:$16 sps:$4 sm:$0xff]   ;;  %v4196_v22 = vld [vmem:[%s6654_s1 + $0x6a0] ss:$16 sps:$4 sm:$0xff]  }
  0x2b   :  { %1767 = vmatpush2.bf16.msra.mxu0 %v4125_v42  ;;  %v4213_v23 = vld [vmem:[%s6654_s1 + $0x684] ss:$16 sps:$4 sm:$0xff]   ;;  %v4184_v24 = vld [vmem:[%s6654_s1 + $0x480] ss:$16 sps:$4 sm:$0xff]  }
  0x2c   :  { %1880 = vmatpush2.bf16.msra.mxu1 %v4126_v43  ;;  %1768 = vmatprep.subr.bf16.mxu0 %v4127_v44  ;;  %v4195_v26 = vld [vmem:[%s6654_s1 + $0x464] ss:$16 sps:$4 sm:$0xff]   ;;  %v4211_v28 = vld [vmem:[%s6654_s1 + $0x680] ss:$16 sps:$4 sm:$0xff]   ;;  %v4219_v43 = vld [vmem:[%s6655_s0 + $0xec] ss:$28 sps:$4 sm:$0xff]  }
  0x2d   :  { %1881 = vmatprep.subr.bf16.mxu1 %v4129_v45  ;;  %v4193_v29 = vld [vmem:[%s6654_s1 + $0x460] ss:$16 sps:$4 sm:$0xff]   ;;  %v4201_v30 = vld [vmem:[%s6654_s1 + $0x444] ss:$16 sps:$4 sm:$0xff]  }
  0x2e   :  { %v4204_v32 = vld [vmem:[%s6655_s0 + $0xb4] ss:$28 sps:$4 sm:$0xff]   ;;  %v4206_v38 = vld [vmem:[%s6655_s0 + $0xa8] ss:$28 sps:$4 sm:$0xff]  }
  0x2f   :  { %1769 = vmatpush2.bf16.msra.mxu0 %v4131_v46  ;;  %v4228_v33 = vld [vmem:[%s6654_s1 + $0x664] ss:$16 sps:$4 sm:$0xff]   ;;  %v4226_v34 = vld [vmem:[%s6654_s1 + $0x660] ss:$16 sps:$4 sm:$0xff]  }
  0x30   :  { %1882 = vmatpush2.bf16.msra.mxu1 %v4132_v47  ;;  %1770 = vmatprep.subr.bf16.mxu0 %v4133_v48  ;;  %v4199_v35 = vld [vmem:[%s6654_s1 + $0x440] ss:$16 sps:$4 sm:$0xff]   ;;  %v4243_v36 = vld [vmem:[%s6654_s1 + $0x644] ss:$16 sps:$4 sm:$0xff]  }
  0x31   :  { %1883 = vmatprep.subr.bf16.mxu1 %v4135_v50  ;;  %v4210_v37 = vld [vmem:[%s6654_s1 + $0x424] ss:$16 sps:$4 sm:$0xff]   ;;  %v4208_v40 = vld [vmem:[%s6654_s1 + $0x420] ss:$16 sps:$4 sm:$0xff]  }
  0x32   :  { %v4216_v41 = vld [vmem:[%s6654_s1 + $0x404] ss:$16 sps:$4 sm:$0xff]   ;;  %v4241_v44 = vld [vmem:[%s6654_s1 + $0x640] ss:$16 sps:$4 sm:$0xff]  }
  0x33   :  { %1771 = vmatpush2.bf16.msra.mxu0 %v4137_v52  ;;  %v4217_v42 = vld [vmem:[%s6655_s0 + $0xe4] ss:$28 sps:$4 sm:$0xff]  }
  0x34   :  { %1884 = vmatpush2.bf16.msra.mxu1 %v4138_v53  ;;  %1772 = vmatprep.subr.bf16.mxu0 %v4139_v54  ;;  %v4258_v45 = vld [vmem:[%s6654_s1 + $0x624] ss:$16 sps:$4 sm:$0xff]   ;;  %v4214_v46 = vld [vmem:[%s6654_s1 + $0x400] ss:$16 sps:$4 sm:$0xff]   ;;  %v4232_v53 = vld [vmem:[%s6655_s0 + $0x11c] ss:$28 sps:$4 sm:$0xff]  }
  0x35   :  { %1885 = vmatprep.subr.bf16.mxu1 %v4141_v55  ;;  %v4221_v47 = vld [vmem:[%s6655_s0 + $0xe0] ss:$28 sps:$4 sm:$0xff]   ;;  %v4225_v48 = vld [vmem:[%s6654_s1 + $0x5e4] ss:$16 sps:$4 sm:$0xff]  }
  0x36   :  { %v4222_v49 = vld [vmem:[%s6655_s0 + $0xe8] ss:$28 sps:$4 sm:$0xff]   ;;  %v4256_v50 = vld [vmem:[%s6654_s1 + $0x620] ss:$16 sps:$4 sm:$0xff]  }
  0x37   :  { %1773 = vmatpush2.bf16.msra.mxu0 %v4143_v56  ;;  %v4223_v51 = vld [vmem:[%s6654_s1 + $0x5e0] ss:$16 sps:$4 sm:$0xff]   ;;  %v4231_v52 = vld [vmem:[%s6654_s1 + $0x5c4] ss:$16 sps:$4 sm:$0xff]  }
  0x38   :  { %1886 = vmatpush2.bf16.msra.mxu1 %v4144_v57  ;;  %1774 = vmatprep.subr.bf16.mxu0 %v4145_v58  ;;  %v4234_v54 = vld [vmem:[%s6655_s0 + $0x124] ss:$28 sps:$4 sm:$0xff]   ;;  %v4286_v58 = vld [vmem:[%s6654_s1 + $0x2ec] ss:$16 sps:$4 sm:$0xff]  }
  0x39   :  { %1887 = vmatprep.subr.bf16.mxu1 %v4147_v59  ;;  %v4273_v55 = vld [vmem:[%s6654_s1 + $0x604] ss:$16 sps:$4 sm:$0xff]   ;;  %v4271_v56 = vld [vmem:[%s6654_s1 + $0x600] ss:$16 sps:$4 sm:$0xff]  }
  0x3a   :  { %v4229_v57 = vld [vmem:[%s6654_s1 + $0x5c0] ss:$16 sps:$4 sm:$0xff]   ;;  %v4240_v59 = vld [vmem:[%s6654_s1 + $0x5a4] ss:$16 sps:$4 sm:$0xff]  }
  0x3b   :  { %1775 = vmatpush2.bf16.msra.mxu0 %v4149_v60  ;;  %v4236_v60 = vld [vmem:[%s6655_s0 + $0x118] ss:$28 sps:$4 sm:$0xff]  }
  0x3c   :  { %1888 = vmatpush2.bf16.msra.mxu1 %v4150_v61  ;;  %1776 = vmatprep.subr.bf16.mxu0 %v4151_v62  ;;  %v4237_v61 = vld [vmem:[%s6655_s0 + $0x120] ss:$28 sps:$4 sm:$0xff]  }
  0x3d   :  { %1889 = vmatprep.subr.bf16.mxu1 %v4153_v63  ;;  %v4238_v62 = vld [vmem:[%s6654_s1 + $0x5a0] ss:$16 sps:$4 sm:$0xff]   ;;  %v4246_v63 = vld [vmem:[%s6654_s1 + $0x584] ss:$16 sps:$4 sm:$0xff]  }
  0x3f   :  { %1777 = vmatpush2.bf16.msra.mxu0 %v4155_v0  ;;  %v4247_v0 = vld [vmem:[%s6655_s0 + $0x154] ss:$28 sps:$4 sm:$0xff]  }
  0x40   :  { %1890 = vmatpush2.bf16.msra.mxu1 %v4156_v1  ;;  %1972 = vmatprep.subr.bf16.mxu0 %v4165_v2  ;;  %v4249_v1 = vld [vmem:[%s6655_s0 + $0x15c] ss:$28 sps:$4 sm:$0xff]   ;;  %v4244_v2 = vld [vmem:[%s6654_s1 + $0x580] ss:$16 sps:$4 sm:$0xff]  }
  0x41   :  { %2085 = vmatprep.subr.bf16.mxu1 %v4168_v3  ;;  %v5078_v3 = vld [vmem:[%s6655_s0 + $0x150] ss:$28 sps:$4 sm:$0xff]  }
  0x42   :  { %1779 = vmatmul.mubr.bf16.vlgmr.msra.gmra.mxu0 %v4157_v4  ;;  %v4255_v4 = vld [vmem:[%s6654_s1 + $0x564] ss:$16 sps:$4 sm:$0xff]  }
  0x43   :  { %1892 = vmatmul.mubr.bf16.vlgmr.msra.gmra.mxu1 %v4160_v5  ;;  %1973 = vmatpush1.bf16.msra.mxu0 %v4163_v6  ;;  %v5086_v5 = vld [vmem:[%s6655_s0 + $0x158] ss:$28 sps:$4 sm:$0xff]   ;;  %v4253_v6 = vld [vmem:[%s6654_s1 + $0x560] ss:$16 sps:$4 sm:$0xff]  }
  0x44   :  { %2086 = vmatpush1.bf16.msra.mxu1 %v4166_v7  ;;  %1974 = vmatprep.subr.bf16.mxu0 %v4171_v8  ;;  %v4261_v7 = vld [vmem:[%s6654_s1 + $0x544] ss:$16 sps:$4 sm:$0xff]   ;;  %v5097_v8 = vld [vmem:[%s6655_s0 + $0x18c] ss:$28 sps:$4 sm:$0xff]  }
  0x45   :  { %1788 = vmatprep.mubr.bf16.mxu0 %v4172_v9  ;;  %1901 = vmatprep.mubr.bf16.mxu1 %v4174_v10  ;;  %v5102_v9 = vld [vmem:[%s6655_s0 + $0x194] ss:$28 sps:$4 sm:$0xff]  }
  0x46   :  { %2087 = vmatprep.subr.bf16.mxu1 %v4183_v11  ;;  %v4259_v10 = vld [vmem:[%s6654_s1 + $0x540] ss:$16 sps:$4 sm:$0xff]   ;;  %v4270_v11 = vld [vmem:[%s6654_s1 + $0x524] ss:$16 sps:$4 sm:$0xff]  }
  0x47   :  { %1975 = vmatpush1.bf16.msra.mxu0 %v4169_v12  ;;  %v5117_v12 = vld [vmem:[%s6655_s0 + $0x188] ss:$28 sps:$4 sm:$0xff]  }
  0x48   :  { %2088 = vmatpush1.bf16.msra.mxu1 %v4181_v14  ;;  %1976 = vmatprep.subr.bf16.mxu0 %v4180_v13  ;;  %v5122_v13 = vld [vmem:[%s6655_s0 + $0x190] ss:$28 sps:$4 sm:$0xff]  }
  0x49   :  { %2089 = vmatprep.subr.bf16.mxu1 %v4198_v15  ;;  %v4268_v14 = vld [vmem:[%s6654_s1 + $0x520] ss:$16 sps:$4 sm:$0xff]  }
  0x4a   :  { %1789 = vmatmul.mubr.bf16.gmra.mxu0 %v4176_v16  ;;  %v5130_v15 = vld [vmem:[%s6655_s0 + $0x14] ss:$28 sps:$4 sm:$0xff]  }
  0x4b   :  { %1902 = vmatmul.mubr.bf16.gmra.mxu1 %v4177_v17  ;;  %1977 = vmatpush1.bf16.msra.mxu0 %v4178_v18  ;;  %v4276_v16 = vld [vmem:[%s6654_s1 + $0x504] ss:$16 sps:$4 sm:$0xff]   ;;  %v4274_v17 = vld [vmem:[%s6654_s1 + $0x500] ss:$16 sps:$4 sm:$0xff]   ;;  %v4631_v18 = vmov 0  }
  0x4c   :  { %1798 = vmatprep.mubr.bf16.mxu0 %v4187_v20  ;;  %1978 = vmatprep.subr.bf16.mxu0 %v4186_v19  ;;  %v4283_v19 = vld [vmem:[%s6654_s1 + $0xec] ss:$16 sps:$4 sm:$0xff]  }
  0x4d   :  { %1911 = vmatprep.mubr.bf16.mxu1 %v4189_v21  ;;  %2090 = vmatpush1.bf16.msra.mxu1 %v4196_v22  ;;  %v5148_v20 = vld [vmem:[%s6655_s0 + $0x10] ss:$28 sps:$4 sm:$0xff]   ;;  %v5153_v21 = vld [vmem:[%s6655_s0 + $0x18] ss:$28 sps:$4 sm:$0xff]  }
  0x4e   :  { %2091 = vmatprep.subr.bf16.mxu1 %v4213_v23  ;;  %v4281_v22 = vld [vmem:[%s6654_s1 + $0xe8] ss:$16 sps:$4 sm:$0xff]  }
  0x4f   :  { %1979 = vmatpush1.bf16.msra.mxu0 %v4184_v24  ;;  %v4284_v23 = vld [vmem:[%s6654_s1 + $0x2e8] ss:$16 sps:$4 sm:$0xff]   ;;  %v4289_v24 = vld [vmem:[%s6654_s1 + $0xcc] ss:$16 sps:$4 sm:$0xff]  }
  0x50   :  { %1980 = vmatprep.subr.bf16.mxu0 %v4195_v26  ;;  %v5170_v26 = vld [vmem:[%s6655_s0 + $0x4c] ss:$28 sps:$4 sm:$0xff]  }
  0x51   :  { %2092 = vmatpush1.bf16.msra.mxu1 %v4211_v28  ;;  %v4290_v28 = vld [vmem:[%s6654_s1 + $0x2c8] ss:$16 sps:$4 sm:$0xff]  }
  0x52   :  { %1799 = vmatmul.mubr.bf16.gmra.mxu0 %v4191_v25  ;;  %2093 = vmatprep.subr.bf16.mxu1 %v4228_v33  ;;  %v4292_v25 = vld [vmem:[%s6654_s1 + $0x2cc] ss:$16 sps:$4 sm:$0xff]   ;;  %v4297_v33 = vld [vmem:[%s6654_s1 + $0xa8] ss:$16 sps:$4 sm:$0xff]  }
  0x53   :  { %1912 = vmatmul.mubr.bf16.gmra.mxu1 %v4192_v27  ;;  %1981 = vmatpush1.bf16.msra.mxu0 %v4193_v29  ;;  %v4287_v27 = vld [vmem:[%s6654_s1 + $0xc8] ss:$16 sps:$4 sm:$0xff]   ;;  %v4299_v29 = vld [vmem:[%s6654_s1 + $0xac] ss:$16 sps:$4 sm:$0xff]  }
  0x54   :  { %1808 = vmatprep.mubr.bf16.mxu0 %v4202_v31  ;;  %1982 = vmatprep.subr.bf16.mxu0 %v4201_v30  ;;  %v4302_v30 = vld [vmem:[%s6654_s1 + $0x2ac] ss:$16 sps:$4 sm:$0xff]   ;;  %v5191_v31 = vld [vmem:[%s6655_s0 + $0x48] ss:$28 sps:$4 sm:$0xff]  }
  0x55   :  { %1921 = vmatprep.mubr.bf16.mxu1 %v4204_v32  ;;  %2094 = vmatpush1.bf16.msra.mxu1 %v4226_v34  ;;  %v5196_v32 = vld [vmem:[%s6655_s0 + $0x50] ss:$28 sps:$4 sm:$0xff]   ;;  %v4300_v34 = vld [vmem:[%s6654_s1 + $0x2a8] ss:$16 sps:$4 sm:$0xff]  }
  0x56   :  { %2095 = vmatprep.subr.bf16.mxu1 %v4243_v36  ;;  %v4308_v36 = vld [vmem:[%s6654_s1 + $0x28c] ss:$16 sps:$4 sm:$0xff]  }
  0x57   :  { %1983 = vmatpush1.bf16.msra.mxu0 %v4199_v35  ;;  %v4305_v35 = vld [vmem:[%s6654_s1 + $0x8c] ss:$16 sps:$4 sm:$0xff]  }
  0x58   :  { %1984 = vmatprep.subr.bf16.mxu0 %v4210_v37  ;;  %v5213_v37 = vld [vmem:[%s6655_s0 + $0x84] ss:$28 sps:$4 sm:$0xff]  }
  0x59   :  { %2096 = vmatpush1.bf16.msra.mxu1 %v4241_v44  ;;  %v4313_v44 = vld [vmem:[%s6654_s1 + $0x68] ss:$16 sps:$4 sm:$0xff]  }
  0x5a   :  { %1809 = vmatmul.mubr.bf16.gmra.mxu0 %v4206_v38  ;;  %2097 = vmatprep.subr.bf16.mxu1 %v4258_v45  ;;  %v4303_v38 = vld [vmem:[%s6654_s1 + $0x88] ss:$16 sps:$4 sm:$0xff]  }
  0x5b   :  { %1922 = vmatmul.mubr.bf16.gmra.mxu1 %v4207_v39  ;;  %1985 = vmatpush1.bf16.msra.mxu0 %v4208_v40  ;;  %v4306_v39 = vld [vmem:[%s6654_s1 + $0x288] ss:$16 sps:$4 sm:$0xff]   ;;  %v5226_v40 = vld [vmem:[%s6655_s0 + $0x80] ss:$28 sps:$4 sm:$0xff]  }
  0x5c   :  { %1818 = vmatprep.mubr.bf16.mxu0 %v4217_v42  ;;  %1986 = vmatprep.subr.bf16.mxu0 %v4216_v41  ;;  %v4315_v41 = vld [vmem:[%s6654_s1 + $0x6c] ss:$16 sps:$4 sm:$0xff]   ;;  %v4316_v45 = vld [vmem:[%s6654_s1 + $0x268] ss:$16 sps:$4 sm:$0xff]  }
  0x5d   :  { %1931 = vmatprep.mubr.bf16.mxu1 %v4219_v43  ;;  %2098 = vmatpush1.bf16.msra.mxu1 %v4256_v50  ;;  %v4318_v42 = vld [vmem:[%s6654_s1 + $0x26c] ss:$16 sps:$4 sm:$0xff]   ;;  %v5239_v43 = vld [vmem:[%s6655_s0 + $0x88] ss:$28 sps:$4 sm:$0xff]  }
  0x5e   :  { %2099 = vmatprep.subr.bf16.mxu1 %v4273_v55  ;;  %v4322_v50 = vld [vmem:[%s6654_s1 + $0x248] ss:$16 sps:$4 sm:$0xff]  }
  0x5f   :  { %1987 = vmatpush1.bf16.msra.mxu0 %v4214_v46  ;;  %v4321_v46 = vld [vmem:[%s6654_s1 + $0x4c] ss:$16 sps:$4 sm:$0xff]   ;;  %v4329_v55 = vld [vmem:[%s6654_s1 + $0x28] ss:$16 sps:$4 sm:$0xff]  }
  0x60   :  { %1988 = vmatprep.subr.bf16.mxu0 %v4225_v48  ;;  %v5256_v48 = vld [vmem:[%s6655_s0 + $0xbc] ss:$28 sps:$4 sm:$0xff]  }
  0x61   :  { %2100 = vmatpush1.bf16.msra.mxu1 %v4271_v56  ;;  %v4332_v56 = vld [vmem:[%s6654_s1 + $0x228] ss:$16 sps:$4 sm:$0xff]  }
  0x62   :  { %1819 = vmatmul.mubr.bf16.gmra.mxu0 %v4221_v47  ;;  %2311 = vmatprep.subr.bf16.mxu1 %v4286_v58  ;;  %v4324_v47 = vld [vmem:[%s6654_s1 + $0x24c] ss:$16 sps:$4 sm:$0xff]  }
  0x63   :  { %1932 = vmatmul.mubr.bf16.gmra.mxu1 %v4222_v49  ;;  %1989 = vmatpush2.bf16.msra.mxu0 %v4223_v51  ;;  %v4319_v49 = vld [vmem:[%s6654_s1 + $0x48] ss:$16 sps:$4 sm:$0xff]   ;;  %v4340_v58 = vld [vmem:[%s6654_s1 + $0x20c] ss:$16 sps:$4 sm:$0xff]  }
  0x64   :  { %1828 = vmatprep.mubr.bf16.mxu0 %v4232_v53  ;;  %1990 = vmatprep.subr.bf16.mxu0 %v4231_v52  ;;  %v5269_v51 = vld [vmem:[%s6655_s0 + $0xb8] ss:$28 sps:$4 sm:$0xff]   ;;  %v4331_v52 = vld [vmem:[%s6654_s1 + $0x2c] ss:$16 sps:$4 sm:$0xff]  }
  0x65   :  { %1941 = vmatprep.mubr.bf16.mxu1 %v4234_v54  ;;  %v4334_v53 = vld [vmem:[%s6654_s1 + $0x22c] ss:$16 sps:$4 sm:$0xff]  }
  0x66   :  { %v5282_v54 = vld [vmem:[%s6655_s0 + $0xc0] ss:$28 sps:$4 sm:$0xff]  }
  0x67   :  { %1991 = vmatpush2.bf16.msra.mxu0 %v4229_v57  ;;  %v4337_v57 = vld [vmem:[%s6654_s1 + $0xc] ss:$16 sps:$4 sm:$0xff]  }
  0x68   :  { %1992 = vmatprep.subr.bf16.mxu0 %v4240_v59  ;;  %v5299_v59 = vld [vmem:[%s6655_s0 + $0xf4] ss:$28 sps:$4 sm:$0xff]  }
  0x6a   :  { %1829 = vmatmul.mubr.bf16.gmra.mxu0 %v4236_v60  ;;  %v4335_v60 = vld [vmem:[%s6654_s1 + $0x8] ss:$16 sps:$4 sm:$0xff]  }
  0x6b   :  { %1942 = vmatmul.mubr.bf16.gmra.mxu1 %v4237_v61  ;;  %1993 = vmatpush2.bf16.msra.mxu0 %v4238_v62  ;;  %v4338_v61 = vld [vmem:[%s6654_s1 + $0x208] ss:$16 sps:$4 sm:$0xff]   ;;  %v4347_v62 = vld [vmem:[%s6654_s1 + $0x1ec] ss:$16 sps:$4 sm:$0xff]  }
  0x6c   :  { %1838 = vmatprep.mubr.bf16.mxu0 %v4247_v0  ;;  %1994 = vmatprep.subr.bf16.mxu0 %v4246_v63  ;;  %v4350_v63 = vld [vmem:[%s6654_s1 + $0x3ec] ss:$16 sps:$4 sm:$0xff]  }
  0x6d   :  { %1951 = vmatprep.mubr.bf16.mxu1 %v4249_v1  ;;  %v5320_v0 = vld [vmem:[%s6655_s0 + $0xf0] ss:$28 sps:$4 sm:$0xff]   ;;  %v5325_v1 = vld [vmem:[%s6655_s0 + $0xf8] ss:$28 sps:$4 sm:$0xff]  }
  0x6f   :  { %1995 = vmatpush2.bf16.msra.mxu0 %v4244_v2  ;;  %v4345_v2 = vld [vmem:[%s6654_s1 + $0x1e8] ss:$16 sps:$4 sm:$0xff]  }
  0x70   :  { %1996 = vmatprep.subr.bf16.mxu0 %v4255_v4  ;;  %v4348_v4 = vld [vmem:[%s6654_s1 + $0x3e8] ss:$16 sps:$4 sm:$0xff]  }
  0x72   :  { %1839 = vmatmul.mubr.bf16.gmra.mxu0 %v5078_v3 }
  0x73   :  { %1952 = vmatmul.mubr.bf16.gmra.mxu1 %v5086_v5  ;;  %1997 = vmatpush2.bf16.msra.mxu0 %v4253_v6  ;;  %v4353_v6 = vld [vmem:[%s6654_s1 + $0x1cc] ss:$16 sps:$4 sm:$0xff]  }
  0x74   :  { %1848 = vmatprep.mubr.bf16.mxu0 %v5097_v8  ;;  %1998 = vmatprep.subr.bf16.mxu0 %v4261_v7  ;;  %v4356_v7 = vld [vmem:[%s6654_s1 + $0x3cc] ss:$16 sps:$4 sm:$0xff]  }
  0x75   :  { %1961 = vmatprep.mubr.bf16.mxu1 %v5102_v9 }
  0x77   :  { %1999 = vmatpush2.bf16.msra.mxu0 %v4259_v10  ;;  %v5342_v10 = vld [vmem:[%s6655_s0 + $0x12c] ss:$28 sps:$4 sm:$0xff]  }
  0x78   :  { %2000 = vmatprep.subr.bf16.mxu0 %v4270_v11  ;;  %v4351_v11 = vld [vmem:[%s6654_s1 + $0x1c8] ss:$16 sps:$4 sm:$0xff]  }
  0x7a   :  { %1849 = vmatmul.mubr.bf16.gmra.mxu0 %v5117_v12 }
  0x7b   :  { %1962 = vmatmul.mubr.bf16.gmra.mxu1 %v5122_v13  ;;  %2001 = vmatpush2.bf16.msra.mxu0 %v4268_v14  ;;  %v4354_v14 = vld [vmem:[%s6654_s1 + $0x3c8] ss:$16 sps:$4 sm:$0xff]  }
  0x7c   :  { %2004 = vmatprep.mubr.bf16.mxu0 %v5130_v15  ;;  %2002 = vmatprep.subr.bf16.mxu0 %v4276_v16  ;;  %v4363_v16 = vld [vmem:[%s6654_s1 + $0x1ac] ss:$16 sps:$4 sm:$0xff]  }
  0x7d   :  { %2117 = vmatprep.mubr.bf16.mxu1 %v4631_v18 }
  0x7f   :  { %2003 = vmatpush2.bf16.msra.mxu0 %v4274_v17  ;;  %v4366_v17 = vld [vmem:[%s6654_s1 + $0x3ac] ss:$16 sps:$4 sm:$0xff]  }
  0x80   :  { %2198 = vmatprep.subr.bf16.mxu0 %v4283_v19  ;;  %v5363_v19 = vld [vmem:[%s6655_s0 + $0x128] ss:$28 sps:$4 sm:$0xff]  }
  0x82   :  { %2005 = vmatmul.mubr.bf16.vlgmr.msra.gmra.mxu0 %v5148_v20 }
  0x83   :  { %2118 = vmatmul.mubr.bf16.vlgmr.msra.gmra.mxu1 %v5153_v21  ;;  %2199 = vmatpush1.bf16.msra.mxu0 %v4281_v22  ;;  %v5368_v22 = vld [vmem:[%s6655_s0 + $0x130] ss:$28 sps:$4 sm:$0xff]  }
  0x84   :  { %2312 = vmatpush1.bf16.msra.mxu1 %v4284_v23  ;;  %2200 = vmatprep.subr.bf16.mxu0 %v4289_v24  ;;  %v4361_v23 = vld [vmem:[%s6654_s1 + $0x1a8] ss:$16 sps:$4 sm:$0xff]  }
  0x85   :  { %2313 = vmatprep.subr.bf16.mxu1 %v4292_v25  ;;  %2014 = vmatprep.mubr.bf16.mxu0 %v5170_v26  ;;  %v4364_v24 = vld [vmem:[%s6654_s1 + $0x3a8] ss:$16 sps:$4 sm:$0xff]   ;;  %v4369_v25 = vld [vmem:[%s6654_s1 + $0x18c] ss:$16 sps:$4 sm:$0xff]  }
  0x86   :  { %2127 = vmatprep.mubr.bf16.mxu1 %v4631_v18 }
  0x87   :  { %2201 = vmatpush1.bf16.msra.mxu0 %v4287_v27  ;;  %v4372_v27 = vld [vmem:[%s6654_s1 + $0x38c] ss:$16 sps:$4 sm:$0xff]  }
  0x88   :  { %2314 = vmatpush1.bf16.msra.mxu1 %v4290_v28  ;;  %2202 = vmatprep.subr.bf16.mxu0 %v4299_v29  ;;  %v5385_v28 = vld [vmem:[%s6655_s0 + $0x164] ss:$28 sps:$4 sm:$0xff]   ;;  %v4367_v29 = vld [vmem:[%s6654_s1 + $0x188] ss:$16 sps:$4 sm:$0xff]  }
  0x89   :  { %2315 = vmatprep.subr.bf16.mxu1 %v4302_v30  ;;  %v4370_v30 = vld [vmem:[%s6654_s1 + $0x388] ss:$16 sps:$4 sm:$0xff]  }
  0x8a   :  { %2015 = vmatmul.mubr.bf16.gmra.mxu0 %v5191_v31 }
  0x8b   :  { %2128 = vmatmul.mubr.bf16.gmra.mxu1 %v5196_v32  ;;  %2203 = vmatpush1.bf16.msra.mxu0 %v4297_v33  ;;  %v4379_v33 = vld [vmem:[%s6654_s1 + $0x16c] ss:$16 sps:$4 sm:$0xff]  }
  0x8c   :  { %2316 = vmatpush1.bf16.msra.mxu1 %v4300_v34  ;;  %2204 = vmatprep.subr.bf16.mxu0 %v4305_v35  ;;  %v4382_v34 = vld [vmem:[%s6654_s1 + $0x36c] ss:$16 sps:$4 sm:$0xff]  }
  0x8d   :  { %2317 = vmatprep.subr.bf16.mxu1 %v4308_v36  ;;  %2024 = vmatprep.mubr.bf16.mxu0 %v5213_v37  ;;  %v5406_v35 = vld [vmem:[%s6655_s0 + $0x160] ss:$28 sps:$4 sm:$0xff]   ;;  %v5411_v36 = vld [vmem:[%s6655_s0 + $0x168] ss:$28 sps:$4 sm:$0xff]  }
  0x8e   :  { %2137 = vmatprep.mubr.bf16.mxu1 %v4631_v18 }
  0x8f   :  { %2205 = vmatpush1.bf16.msra.mxu0 %v4303_v38  ;;  %v4377_v38 = vld [vmem:[%s6654_s1 + $0x168] ss:$16 sps:$4 sm:$0xff]  }
  0x90   :  { %2318 = vmatpush1.bf16.msra.mxu1 %v4306_v39  ;;  %2206 = vmatprep.subr.bf16.mxu0 %v4315_v41  ;;  %v4380_v39 = vld [vmem:[%s6654_s1 + $0x368] ss:$16 sps:$4 sm:$0xff]   ;;  %v4385_v41 = vld [vmem:[%s6654_s1 + $0x14c] ss:$16 sps:$4 sm:$0xff]  }
  0x91   :  { %2319 = vmatprep.subr.bf16.mxu1 %v4318_v42  ;;  %v4388_v42 = vld [vmem:[%s6654_s1 + $0x34c] ss:$16 sps:$4 sm:$0xff]  }
  0x92   :  { %2025 = vmatmul.mubr.bf16.gmra.mxu0 %v5226_v40 }
  0x93   :  { %2138 = vmatmul.mubr.bf16.gmra.mxu1 %v5239_v43  ;;  %2207 = vmatpush1.bf16.msra.mxu0 %v4313_v44  ;;  %v5428_v44 = vld [vmem:[%s6655_s0 + $0x19c] ss:$28 sps:$4 sm:$0xff]  }
  0x94   :  { %2320 = vmatpush1.bf16.msra.mxu1 %v4316_v45  ;;  %2208 = vmatprep.subr.bf16.mxu0 %v4321_v46  ;;  %v4383_v45 = vld [vmem:[%s6654_s1 + $0x148] ss:$16 sps:$4 sm:$0xff]  }
  0x95   :  { %2321 = vmatprep.subr.bf16.mxu1 %v4324_v47  ;;  %2034 = vmatprep.mubr.bf16.mxu0 %v5256_v48  ;;  %v4386_v46 = vld [vmem:[%s6654_s1 + $0x348] ss:$16 sps:$4 sm:$0xff]   ;;  %v4395_v47 = vld [vmem:[%s6654_s1 + $0x12c] ss:$16 sps:$4 sm:$0xff]  }
  0x96   :  { %2147 = vmatprep.mubr.bf16.mxu1 %v4631_v18 }
  0x97   :  { %2209 = vmatpush1.bf16.msra.mxu0 %v4319_v49  ;;  %v4398_v49 = vld [vmem:[%s6654_s1 + $0x32c] ss:$16 sps:$4 sm:$0xff]  }
  0x98   :  { %2322 = vmatpush1.bf16.msra.mxu1 %v4322_v50  ;;  %2210 = vmatprep.subr.bf16.mxu0 %v4331_v52  ;;  %v5449_v50 = vld [vmem:[%s6655_s0 + $0x198] ss:$28 sps:$4 sm:$0xff]   ;;  %v5454_v52 = vld [vmem:[%s6655_s0 + $0x1a0] ss:$28 sps:$4 sm:$0xff]  }
  0x99   :  { %2323 = vmatprep.subr.bf16.mxu1 %v4334_v53  ;;  %v4393_v53 = vld [vmem:[%s6654_s1 + $0x128] ss:$16 sps:$4 sm:$0xff]  }
  0x9a   :  { %2035 = vmatmul.mubr.bf16.gmra.mxu0 %v5269_v51 }
  0x9b   :  { %2148 = vmatmul.mubr.bf16.gmra.mxu1 %v5282_v54  ;;  %2211 = vmatpush1.bf16.msra.mxu0 %v4329_v55  ;;  %v4396_v55 = vld [vmem:[%s6654_s1 + $0x328] ss:$16 sps:$4 sm:$0xff]  }
  0x9c   :  { %2324 = vmatpush1.bf16.msra.mxu1 %v4332_v56  ;;  %2212 = vmatprep.subr.bf16.mxu0 %v4337_v57  ;;  %v4401_v56 = vld [vmem:[%s6654_s1 + $0x10c] ss:$16 sps:$4 sm:$0xff]  }
  0x9d   :  { %2325 = vmatprep.subr.bf16.mxu1 %v4340_v58  ;;  %2044 = vmatprep.mubr.bf16.mxu0 %v5299_v59  ;;  %v4404_v57 = vld [vmem:[%s6654_s1 + $0x30c] ss:$16 sps:$4 sm:$0xff]   ;;  %v4399_v58 = vld [vmem:[%s6654_s1 + $0x108] ss:$16 sps:$4 sm:$0xff]  }
  0x9e   :  { %2157 = vmatprep.mubr.bf16.mxu1 %v4631_v18 }
  0x9f   :  { %2213 = vmatpush1.bf16.msra.mxu0 %v4335_v60  ;;  %v4402_v60 = vld [vmem:[%s6654_s1 + $0x308] ss:$16 sps:$4 sm:$0xff]  }
  0xa0   :  { %2326 = vmatpush1.bf16.msra.mxu1 %v4338_v61  ;;  %2214 = vmatprep.subr.bf16.mxu0 %v4347_v62  ;;  %v4407_v61 = vld [vmem:[%s6654_s1 + $0x4ec] ss:$16 sps:$4 sm:$0xff]  }
  0xa1   :  { %2327 = vmatprep.subr.bf16.mxu1 %v4350_v63  ;;  %v4410_v62 = vld [vmem:[%s6654_s1 + $0x6ec] ss:$16 sps:$4 sm:$0xff]   ;;  %v4605_v63 = vld [vmem:[%s6655_s0 + $0x4] ss:$28 sps:$4 sm:$0xff]  }
  0xa2   :  { %2045 = vmatmul.mubr.bf16.gmra.mxu0 %v5320_v0 }
  0xa3   :  { %2158 = vmatmul.mubr.bf16.gmra.mxu1 %v5325_v1  ;;  %2215 = vmatpush2.bf16.msra.mxu0 %v4345_v2  ;;  %v4606_v2 = vld [vmem:[%s6655_s0 + $0xc] ss:$28 sps:$4 sm:$0xff]  }
  0xa4   :  { %2328 = vmatpush2.bf16.msra.mxu1 %v4348_v4  ;;  %2216 = vmatprep.subr.bf16.mxu0 %v4353_v6  ;;  %v4405_v4 = vld [vmem:[%s6654_s1 + $0x4e8] ss:$16 sps:$4 sm:$0xff]  }
  0xa5   :  { %2329 = vmatprep.subr.bf16.mxu1 %v4356_v7  ;;  %2054 = vmatprep.mubr.bf16.mxu0 %v5342_v10  ;;  %v4408_v6 = vld [vmem:[%s6654_s1 + $0x6e8] ss:$16 sps:$4 sm:$0xff]   ;;  %v4413_v7 = vld [vmem:[%s6654_s1 + $0x4cc] ss:$16 sps:$4 sm:$0xff]  }
  0xa6   :  { %2167 = vmatprep.mubr.bf16.mxu1 %v4631_v18 }
  0xa7   :  { %2217 = vmatpush2.bf16.msra.mxu0 %v4351_v11  ;;  %v4419_v11 = vld [vmem:[%s6654_s1 + $0x6cc] ss:$16 sps:$4 sm:$0xff]  }
  0xa8   :  { %2330 = vmatpush2.bf16.msra.mxu1 %v4354_v14  ;;  %2218 = vmatprep.subr.bf16.mxu0 %v4363_v16  ;;  %v4607_v14 = vld [vmem:[%s6655_s0] ss:$28 sps:$4 sm:$0xff]   ;;  %v4608_v16 = vld [vmem:[%s6655_s0 + $0x8] ss:$28 sps:$4 sm:$0xff]  }
  0xa9   :  { %2331 = vmatprep.subr.bf16.mxu1 %v4366_v17  ;;  %v4411_v17 = vld [vmem:[%s6654_s1 + $0x4c8] ss:$16 sps:$4 sm:$0xff]  }
  0xaa   :  { %2055 = vmatmul.mubr.bf16.gmra.mxu0 %v5363_v19 }
  0xab   :  { %2168 = vmatmul.mubr.bf16.gmra.mxu1 %v5368_v22  ;;  %2219 = vmatpush2.bf16.msra.mxu0 %v4361_v23  ;;  %v4417_v23 = vld [vmem:[%s6654_s1 + $0x6c8] ss:$16 sps:$4 sm:$0xff]  }
  0xac   :  { %2332 = vmatpush2.bf16.msra.mxu1 %v4364_v24  ;;  %2220 = vmatprep.subr.bf16.mxu0 %v4369_v25  ;;  %v4609_v24 = vld [vmem:[%s6655_s0 + $0x3c] ss:$28 sps:$4 sm:$0xff]  }
  0xad   :  { %2333 = vmatprep.subr.bf16.mxu1 %v4372_v27  ;;  %2064 = vmatprep.mubr.bf16.mxu0 %v5385_v28  ;;  %v4416_v25 = vld [vmem:[%s6654_s1 + $0x4ac] ss:$16 sps:$4 sm:$0xff]  }
  0xae   :  { %2177 = vmatprep.mubr.bf16.mxu1 %v4631_v18  ;;  %v4428_v27 = vld [vmem:[%s6654_s1 + $0x6ac] ss:$16 sps:$4 sm:$0xff]  }
  0xaf   :  { %2221 = vmatpush2.bf16.msra.mxu0 %v4367_v29  ;;  %v4610_v29 = vld [vmem:[%s6655_s0 + $0x44] ss:$28 sps:$4 sm:$0xff]  }
  0xb0   :  { %2334 = vmatpush2.bf16.msra.mxu1 %v4370_v30  ;;  %2222 = vmatprep.subr.bf16.mxu0 %v4379_v33  ;;  %v4414_v30 = vld [vmem:[%s6654_s1 + $0x4a8] ss:$16 sps:$4 sm:$0xff]   ;;  %v4422_v33 = vld [vmem:[%s6654_s1 + $0x48c] ss:$16 sps:$4 sm:$0xff]  }
  0xb1   :  { %2335 = vmatprep.subr.bf16.mxu1 %v4382_v34  ;;  %v4426_v34 = vld [vmem:[%s6654_s1 + $0x6a8] ss:$16 sps:$4 sm:$0xff]  }
  0xb2   :  { %2065 = vmatmul.mubr.bf16.gmra.mxu0 %v5406_v35 }
  0xb3   :  { %2178 = vmatmul.mubr.bf16.gmra.mxu1 %v5411_v36  ;;  %2223 = vmatpush2.bf16.msra.mxu0 %v4377_v38  ;;  %v4611_v38 = vld [vmem:[%s6655_s0 + $0x38] ss:$28 sps:$4 sm:$0xff]  }
  0xb4   :  { %2336 = vmatpush2.bf16.msra.mxu1 %v4380_v39  ;;  %2224 = vmatprep.subr.bf16.mxu0 %v4385_v41  ;;  %v4612_v39 = vld [vmem:[%s6655_s0 + $0x40] ss:$28 sps:$4 sm:$0xff]  }
  0xb5   :  { %2337 = vmatprep.subr.bf16.mxu1 %v4388_v42  ;;  %2074 = vmatprep.mubr.bf16.mxu0 %v5428_v44  ;;  %v4437_v41 = vld [vmem:[%s6654_s1 + $0x68c] ss:$16 sps:$4 sm:$0xff]   ;;  %v4420_v42 = vld [vmem:[%s6654_s1 + $0x488] ss:$16 sps:$4 sm:$0xff]  }
  0xb6   :  { %2187 = vmatprep.mubr.bf16.mxu1 %v4631_v18 }
  0xb7   :  { %2225 = vmatpush2.bf16.msra.mxu0 %v4383_v45  ;;  %v4613_v45 = vld [vmem:[%s6655_s0 + $0x74] ss:$28 sps:$4 sm:$0xff]  }
  0xb8   :  { %2338 = vmatpush2.bf16.msra.mxu1 %v4386_v46  ;;  %2226 = vmatprep.subr.bf16.mxu0 %v4395_v47  ;;  %v4614_v46 = vld [vmem:[%s6655_s0 + $0x7c] ss:$28 sps:$4 sm:$0xff]  }
  0xb9   :  { %2339 = vmatprep.subr.bf16.mxu1 %v4398_v49  ;;  %v4425_v47 = vld [vmem:[%s6654_s1 + $0x46c] ss:$16 sps:$4 sm:$0xff]   ;;  %v4435_v49 = vld [vmem:[%s6654_s1 + $0x688] ss:$16 sps:$4 sm:$0xff]  }
  0xba   :  { %2075 = vmatmul.mubr.bf16.gmra.mxu0 %v5449_v50 }
  0xbb   :  { %2188 = vmatmul.mubr.bf16.gmra.mxu1 %v5454_v52  ;;  %2227 = vmatpush2.bf16.msra.mxu0 %v4393_v53  ;;  %v4423_v53 = vld [vmem:[%s6654_s1 + $0x468] ss:$16 sps:$4 sm:$0xff]  }
  0xbc   :  { %2340 = vmatpush2.bf16.msra.mxu1 %v4396_v55  ;;  %2228 = vmatprep.subr.bf16.mxu0 %v4401_v56  ;;  %v4431_v55 = vld [vmem:[%s6654_s1 + $0x44c] ss:$16 sps:$4 sm:$0xff]   ;;  %v4444_v56 = vld [vmem:[%s6654_s1 + $0x668] ss:$16 sps:$4 sm:$0xff]  }
  0xbd   :  { %2341 = vmatprep.subr.bf16.mxu1 %v4404_v57  ;;  %2230 = vmatprep.mubr.bf16.mxu0 %v4605_v63  ;;  %v4429_v57 = vld [vmem:[%s6654_s1 + $0x448] ss:$16 sps:$4 sm:$0xff]   ;;  %v4434_v63 = vld [vmem:[%s6654_s1 + $0x42c] ss:$16 sps:$4 sm:$0xff]  }
  0xbe   :  { %2343 = vmatprep.mubr.bf16.mxu1 %v4606_v2  ;;  %v4617_v2 = vld [vmem:[%s6655_s0 + $0xac] ss:$28 sps:$4 sm:$0xff]  }
  0xbf   :  { %2229 = vmatpush2.bf16.msra.mxu0 %v4399_v58  ;;  %v4446_v58 = vld [vmem:[%s6654_s1 + $0x66c] ss:$16 sps:$4 sm:$0xff]  }
  0xc0   :  { %2342 = vmatpush2.bf16.msra.mxu1 %v4402_v60  ;;  %2424 = vmatprep.subr.bf16.mxu0 %v4407_v61  ;;  %v4455_v60 = vld [vmem:[%s6654_s1 + $0x64c] ss:$16 sps:$4 sm:$0xff]  }
  0xc1   :  { %2537 = vmatprep.subr.bf16.mxu1 %v4410_v62  ;;  %v4615_v61 = vld [vmem:[%s6655_s0 + $0x70] ss:$28 sps:$4 sm:$0xff]   ;;  %v4616_v62 = vld [vmem:[%s6655_s0 + $0x78] ss:$28 sps:$4 sm:$0xff]  }
  0xc2   :  { %2231 = vmatmul.mubr.bf16.vlgmr.msra.gmra.mxu0 %v4607_v14  ;;  %v4464_v14 = vld [vmem:[%s6654_s1 + $0x62c] ss:$16 sps:$4 sm:$0xff]  }
  0xc3   :  { %2344 = vmatmul.mubr.bf16.vlgmr.msra.gmra.mxu1 %v4608_v16  ;;  %2425 = vmatpush1.bf16.msra.mxu0 %v4405_v4  ;;  %v4618_v4 = vld [vmem:[%s6655_s0 + $0xb4] ss:$28 sps:$4 sm:$0xff]   ;;  %v4438_v16 = vld [vmem:[%s6654_s1 + $0x408] ss:$16 sps:$4 sm:$0xff]  }
  0xc4   :  { %2538 = vmatpush1.bf16.msra.mxu1 %v4408_v6  ;;  %2426 = vmatprep.subr.bf16.mxu0 %v4413_v7  ;;  %v4432_v6 = vld [vmem:[%s6654_s1 + $0x428] ss:$16 sps:$4 sm:$0xff]   ;;  %v4440_v7 = vld [vmem:[%s6654_s1 + $0x40c] ss:$16 sps:$4 sm:$0xff]  }
  0xc5   :  { %2240 = vmatprep.mubr.bf16.mxu0 %v4609_v24  ;;  %2353 = vmatprep.mubr.bf16.mxu1 %v4610_v29  ;;  %v4621_v24 = vld [vmem:[%s6655_s0 + $0xe4] ss:$28 sps:$4 sm:$0xff]   ;;  %v4462_v29 = vld [vmem:[%s6654_s1 + $0x628] ss:$16 sps:$4 sm:$0xff]  }
  0xc6   :  { %2539 = vmatprep.subr.bf16.mxu1 %v4419_v11  ;;  %v4453_v11 = vld [vmem:[%s6654_s1 + $0x648] ss:$16 sps:$4 sm:$0xff]  }
  0xc7   :  { %2427 = vmatpush1.bf16.msra.mxu0 %v4411_v17  ;;  %v4619_v17 = vld [vmem:[%s6655_s0 + $0xa8] ss:$28 sps:$4 sm:$0xff]  }
  0xc8   :  { %2540 = vmatpush1.bf16.msra.mxu1 %v4417_v23  ;;  %2428 = vmatprep.subr.bf16.mxu0 %v4416_v25  ;;  %v4620_v23 = vld [vmem:[%s6655_s0 + $0xb0] ss:$28 sps:$4 sm:$0xff]  }
  0xc9   :  { %2541 = vmatprep.subr.bf16.mxu1 %v4428_v27  ;;  %v4622_v25 = vld [vmem:[%s6655_s0 + $0xec] ss:$28 sps:$4 sm:$0xff]  }
  0xca   :  { %2241 = vmatmul.mubr.bf16.gmra.mxu0 %v4611_v38  ;;  %v4443_v27 = vld [vmem:[%s6654_s1 + $0x5ec] ss:$16 sps:$4 sm:$0xff]  }
  0xcb   :  { %2354 = vmatmul.mubr.bf16.gmra.mxu1 %v4612_v39  ;;  %2429 = vmatpush1.bf16.msra.mxu0 %v4414_v30  ;;  %v4441_v30 = vld [vmem:[%s6654_s1 + $0x5e8] ss:$16 sps:$4 sm:$0xff]   ;;  %v4623_v38 = vld [vmem:[%s6655_s0 + $0xe0] ss:$28 sps:$4 sm:$0xff]  }
  0xcc   :  { %2250 = vmatprep.mubr.bf16.mxu0 %v4613_v45  ;;  %2430 = vmatprep.subr.bf16.mxu0 %v4422_v33  ;;  %v4449_v33 = vld [vmem:[%s6654_s1 + $0x5cc] ss:$16 sps:$4 sm:$0xff]   ;;  %v4624_v39 = vld [vmem:[%s6655_s0 + $0xe8] ss:$28 sps:$4 sm:$0xff]  }
  0xcd   :  { %2363 = vmatprep.mubr.bf16.mxu1 %v4614_v46  ;;  %2542 = vmatpush1.bf16.msra.mxu1 %v4426_v34  ;;  %v4473_v34 = vld [vmem:[%s6654_s1 + $0x60c] ss:$16 sps:$4 sm:$0xff]   ;;  %v4626_v46 = vld [vmem:[%s6655_s0 + $0x124] ss:$28 sps:$4 sm:$0xff]  }
  0xce   :  { %2543 = vmatprep.subr.bf16.mxu1 %v4437_v41  ;;  %v4471_v41 = vld [vmem:[%s6654_s1 + $0x608] ss:$16 sps:$4 sm:$0xff]  }
  0xcf   :  { %2431 = vmatpush1.bf16.msra.mxu0 %v4420_v42  ;;  %v4447_v42 = vld [vmem:[%s6654_s1 + $0x5c8] ss:$16 sps:$4 sm:$0xff]  }
  0xd0   :  { %2432 = vmatprep.subr.bf16.mxu0 %v4425_v47  ;;  %v4625_v45 = vld [vmem:[%s6655_s0 + $0x11c] ss:$28 sps:$4 sm:$0xff]  }
  0xd1   :  { %2544 = vmatpush1.bf16.msra.mxu1 %v4435_v49  ;;  %v4452_v47 = vld [vmem:[%s6654_s1 + $0x5ac] ss:$16 sps:$4 sm:$0xff]   ;;  %v4450_v49 = vld [vmem:[%s6654_s1 + $0x5a8] ss:$16 sps:$4 sm:$0xff]  }
  0xd2   :  { %2251 = vmatmul.mubr.bf16.gmra.mxu0 %v4615_v61  ;;  %2545 = vmatprep.subr.bf16.mxu1 %v4446_v58  ;;  %v4629_v58 = vld [vmem:[%s6655_s0 + $0x154] ss:$28 sps:$4 sm:$0xff]   ;;  %v4461_v61 = vld [vmem:[%s6654_s1 + $0x56c] ss:$16 sps:$4 sm:$0xff]  }
  0xd3   :  { %2364 = vmatmul.mubr.bf16.gmra.mxu1 %v4616_v62  ;;  %2433 = vmatpush1.bf16.msra.mxu0 %v4423_v53  ;;  %v4458_v53 = vld [vmem:[%s6654_s1 + $0x58c] ss:$16 sps:$4 sm:$0xff]   ;;  %v4459_v62 = vld [vmem:[%s6654_s1 + $0x568] ss:$16 sps:$4 sm:$0xff]  }
  0xd4   :  { %2260 = vmatprep.mubr.bf16.mxu0 %v4617_v2  ;;  %2434 = vmatprep.subr.bf16.mxu0 %v4431_v55  ;;  %v4627_v55 = vld [vmem:[%s6655_s0 + $0x118] ss:$28 sps:$4 sm:$0xff]  }
  0xd5   :  { %2373 = vmatprep.mubr.bf16.mxu1 %v4618_v4  ;;  %2546 = vmatpush1.bf16.msra.mxu1 %v4444_v56  ;;  %v4628_v56 = vld [vmem:[%s6655_s0 + $0x120] ss:$28 sps:$4 sm:$0xff]   ;;  %v4465_v2 = vld [vmem:[%s6654_s1 + $0x548] ss:$16 sps:$4 sm:$0xff]   ;;  %v6664_v4 = vlaneseq }
  0xd6   :  { %2547 = vmatprep.subr.bf16.mxu1 %v4455_v60  ;;  %v4630_v60 = vld [vmem:[%s6655_s0 + $0x15c] ss:$28 sps:$4 sm:$0xff]  }
  0xd7   :  { %2435 = vmatpush1.bf16.msra.mxu0 %v4429_v57  ;;  %v4456_v57 = vld [vmem:[%s6654_s1 + $0x588] ss:$16 sps:$4 sm:$0xff]  }
  0xd8   :  { %2436 = vmatprep.subr.bf16.mxu0 %v4434_v63  ;;  %v4467_v63 = vld [vmem:[%s6654_s1 + $0x54c] ss:$16 sps:$4 sm:$0xff]  }
  0xd9   :  { %2548 = vmatpush1.bf16.msra.mxu1 %v4453_v11  ;;  %v5713_v11 = vld [vmem:[%s6657_s2] sm:$0xf] }
  0xda   :  { %2261 = vmatmul.mubr.bf16.gmra.mxu0 %v4619_v17  ;;  %2549 = vmatprep.subr.bf16.mxu1 %v4464_v14  ;;  %6673 = vst [vmem:[#allocation3_spill] sm:$0xff] %v5713_v11  ;;  %v4477_v14 = vld [vmem:[%s6656_s3 + $0x70] ss:$8 sps:$4 sm:$0xff]   ;;  %v4482_v17 = vld [vmem:[%s6656_s3 + $0x64] ss:$8 sps:$4 sm:$0xff]  }
  0xdb   :  { %2374 = vmatmul.mubr.bf16.gmra.mxu1 %v4620_v23  ;;  %2437 = vmatpush1.bf16.msra.mxu0 %v4432_v6  ;;  %v4470_v6 = vld [vmem:[%s6654_s1 + $0x52c] ss:$16 sps:$4 sm:$0xff]  }
  0xdc   :  { %2270 = vmatprep.mubr.bf16.mxu0 %v4621_v24  ;;  %2438 = vmatprep.subr.bf16.mxu0 %v4440_v7 }
  0xdd   :  { %2383 = vmatprep.mubr.bf16.mxu1 %v4622_v25  ;;  %2550 = vmatpush1.bf16.msra.mxu1 %v4462_v29 }
  0xde   :  { %2551 = vmatprep.subr.bf16.mxu1 %v4473_v34 }
  0xdf   :  { %2439 = vmatpush1.bf16.msra.mxu0 %v4438_v16 }
  0xe0   :  { %2440 = vmatprep.subr.bf16.mxu0 %v4443_v27 }
  0xe1   :  { %2552 = vmatpush1.bf16.msra.mxu1 %v4471_v41 }
  0xe2   :  { %2271 = vmatmul.mubr.bf16.gmra.mxu0 %v4623_v38 }
  0xe3   :  { %2384 = vmatmul.mubr.bf16.gmra.mxu1 %v4624_v39  ;;  %2441 = vmatpush2.bf16.msra.mxu0 %v4441_v30  ;;  %v4480_v30 = vld [vmem:[%s6656_s3 + $0x60] ss:$8 sps:$4 sm:$0xff]  }
  0xe4   :  { %2280 = vmatprep.mubr.bf16.mxu0 %v4625_v45  ;;  %2442 = vmatprep.subr.bf16.mxu0 %v4449_v33  ;;  %v4488_v45 = vld [vmem:[%s6656_s3 + $0x44] ss:$8 sps:$4 sm:$0xff]  }
  0xe5   :  { %2393 = vmatprep.mubr.bf16.mxu1 %v4626_v46 }
  0xe7   :  { %2443 = vmatpush2.bf16.msra.mxu0 %v4447_v42  ;;  %v4483_v42 = vld [vmem:[%s6656_s3 + $0x50] ss:$8 sps:$4 sm:$0xff]  }
  0xe8   :  { %2444 = vmatprep.subr.bf16.mxu0 %v4452_v47 }
  0xea   :  { %2281 = vmatmul.mubr.bf16.gmra.mxu0 %v4627_v55 }
  0xeb   :  { %2394 = vmatmul.mubr.bf16.gmra.mxu1 %v4628_v56  ;;  %2445 = vmatpush2.bf16.msra.mxu0 %v4450_v49  ;;  %v4486_v56 = vld [vmem:[%s6656_s3 + $0x40] ss:$8 sps:$4 sm:$0xff]  }
  0xec   :  { %2290 = vmatprep.mubr.bf16.mxu0 %v4629_v58  ;;  %2446 = vmatprep.subr.bf16.mxu0 %v4458_v53 }
  0xed   :  { %2403 = vmatprep.mubr.bf16.mxu1 %v4630_v60 }
  0xef   :  { %2447 = vmatpush2.bf16.msra.mxu0 %v4456_v57 }
  0xf0   :  { %2448 = vmatprep.subr.bf16.mxu0 %v4461_v61 }
  0xf2   :  { %2291 = vmatmul.mubr.bf16.gmra.mxu0 %v5078_v3  ;;  %v4468_v3 = vld [vmem:[%s6654_s1 + $0x528] ss:$16 sps:$4 sm:$0xff]  }
  0xf3   :  { %2404 = vmatmul.mubr.bf16.gmra.mxu1 %v5086_v5  ;;  %2449 = vmatpush2.bf16.msra.mxu0 %v4459_v62  ;;  %v5697_v5 = vshrl.u32 %v6664_v4, 7 }
  0xf4   :  { %2300 = vmatprep.mubr.bf16.mxu0 %v5097_v8  ;;  %2450 = vmatprep.subr.bf16.mxu0 %v4467_v63  ;;  %v4476_v8 = vld [vmem:[%s6654_s1 + $0x50c] ss:$16 sps:$4 sm:$0xff]   ;;  %v4489_v63 = vld [vmem:[%s6656_s3 + $0x30] ss:$8 sps:$4 sm:$0xff]  }
  0xf5   :  { %2413 = vmatprep.mubr.bf16.mxu1 %v5102_v9  ;;  %6672 = vst [vmem:[#allocation2_spill] sm:$0xff] %v5697_v5  ;;  %v4474_v9 = vld [vmem:[%s6654_s1 + $0x508] ss:$16 sps:$4 sm:$0xff]   ;;  %v6666_v7 = vsub.s32 0, %v5697_v5 }
  0xf7   :  { %2451 = vmatpush2.bf16.msra.mxu0 %v4465_v2  ;;  %v4527_v2 = vld [vmem:[%s6656_s3 + $0x174] ss:$8 sps:$4 sm:$0xff]  }
  0xf8   :  { %2452 = vmatprep.subr.bf16.mxu0 %v4470_v6  ;;  %v4494_v6 = vld [vmem:[%s6656_s3 + $0x24] ss:$8 sps:$4 sm:$0xff]   ;;  %3255 = vmatprep.subr.bf16.mxu1 %v4527_v2  ;;  %v4534_v2 = vld [vmem:[%s6656_s3 + $0x140] ss:$8 sps:$4 sm:$0xff]  }
  0xfa   :  { %2301 = vmatmul.mubr.bf16.gmra.mxu0 %v5117_v12  ;;  %v4479_v12 = vld [vmem:[%s6656_s3 + $0x74] ss:$8 sps:$4 sm:$0xff]  }
  0xfb   :  { %2414 = vmatmul.mubr.bf16.gmra.mxu1 %v5122_v13  ;;  %2453 = vmatpush2.bf16.msra.mxu0 %v4468_v3  ;;  %v6665_v13 = vsub.s32 1, %v5697_v5  ;;  %v4525_v3 = vld [vmem:[%s6656_s3 + $0x170] ss:$8 sps:$4 sm:$0xff]  }
  0xfc   :  { %2456 = vmatprep.mubr.bf16.mxu0 %v5130_v15  ;;  %2454 = vmatprep.subr.bf16.mxu0 %v4476_v8  ;;  %v5722_v15 = vrot.slane %v5713_v11, %v6666_v7 }
  0xfd   :  { %2569 = vmatprep.mubr.bf16.mxu1 %v4631_v18  ;;  %v5730_v16 = vrot.slane %v5713_v11, %v6665_v13 }
  0xff   :  { %2455 = vmatpush2.bf16.msra.mxu0 %v4474_v9 }
 0x100   :  { %3142 = vmatprep.subr.bf16.mxu0 %v4479_v12 }
 0x102   :  { %v1780_v23 = vpop.f32.mrf.mxu0  ;;  %2457 = vmatmul.mubr.bf16.vlgmr.msra.gmra.mxu0 %v5148_v20  ;;  %v4485_v20 = vld [vmem:[%s6656_s3 + $0x54] ss:$8 sps:$4 sm:$0xff]  }
 0x103   :  { %v1893_v24 = vpop.f32.mrf.mxu1  ;;  %2570 = vmatmul.mubr.bf16.vlgmr.msra.gmra.mxu1 %v5153_v21  ;;  %v1781_v25 = vadd.f32 %v1780_v23, %v5722_v15  ;;  %2466 = vmatprep.mubr.bf16.mxu0 %v5170_v26  ;;  %v4492_v23 = vld [vmem:[%s6656_s3 + $0x20] ss:$8 sps:$4 sm:$0xff]  }
 0x104   :  { %2579 = vmatprep.mubr.bf16.mxu1 %v4631_v18  ;;  %v1782_v27 = vpop.f32.mrf.mxu0  ;;  %3143 = vmatpush1.bf16.msra.mxu0 %v4477_v14 }
 0x105   :  { %v1895_v29 = vpop.f32.mrf.mxu1  ;;  %v5743_v33 = vadd.f32 %v1893_v24, %v1781_v25  ;;  %v1783_v34 = vadd.f32 %v1782_v27, %v5730_v16  ;;  %3144 = vmatprep.subr.bf16.mxu0 %v4482_v17  ;;  %3256 = vmatpush1.bf16.msra.mxu1 %v4525_v3  ;;  %v4528_v25 = vld [vmem:[%s6656_s3 + $0x160] ss:$8 sps:$4 sm:$0xff]  }
 0x106   :  { %v5749_v21 = vpop.f32.mrf.mxu0 }
 0x107   :  { %v5751_v26 = vpop.f32.mrf.mxu1  ;;  %v5753_v38 = vadd.f32 %v1895_v29, %v1783_v34 }
 0x108   :  { %v5755_v39 = vpop.f32.mrf.mxu0  ;;  %3145 = vmatpush1.bf16.msra.mxu0 %v4480_v30 }
 0x109   :  { %v5757_v41 = vpop.f32.mrf.mxu1  ;;  %3146 = vmatprep.subr.bf16.mxu0 %v4485_v20 }
 0x10a   :  { %v1790_v46 = vpop.f32.mrf.mxu0  ;;  %2467 = vmatmul.mubr.bf16.gmra.mxu0 %v5191_v31  ;;  %v4491_v31 = vld [vmem:[%s6656_s3 + $0x34] ss:$8 sps:$4 sm:$0xff]  }
 0x10b   :  { %v1903_v47 = vpop.f32.mrf.mxu1  ;;  %2580 = vmatmul.mubr.bf16.gmra.mxu1 %v5196_v32  ;;  %v1791_v49 = vadd.f32 %v1790_v46, %v5722_v15  ;;  %2476 = vmatprep.mubr.bf16.mxu0 %v5213_v37  ;;  %v4500_v46 = vld [vmem:[%s6656_s3 + $0x4] ss:$8 sps:$4 sm:$0xff]  }
 0x10c   :  { %2589 = vmatprep.mubr.bf16.mxu1 %v4631_v18  ;;  %v1792_v53 = vpop.f32.mrf.mxu0  ;;  %3147 = vmatpush1.bf16.msra.mxu0 %v4483_v42  ;;  %v4495_v42 = vld [vmem:[%s6656_s3 + $0x10] ss:$8 sps:$4 sm:$0xff]  }
 0x10d   :  { %v1905_v55 = vpop.f32.mrf.mxu1  ;;  %v5773_v57 = vadd.f32 %v1903_v47, %v1791_v49  ;;  %v1793_v58 = vadd.f32 %v1792_v53, %v5730_v16  ;;  %3148 = vmatprep.subr.bf16.mxu0 %v4488_v45  ;;  %v4533_v45 = vld [vmem:[%s6656_s3 + $0x154] ss:$8 sps:$4 sm:$0xff]   ;;  %v4531_v47 = vld [vmem:[%s6656_s3 + $0x150] ss:$8 sps:$4 sm:$0xff]  }
 0x10e   :  { %v5779_v32 = vpop.f32.mrf.mxu0 }
 0x10f   :  { %v5781_v37 = vpop.f32.mrf.mxu1  ;;  %v5783_v60 = vadd.f32 %v1905_v55, %v1793_v58 }
 0x110   :  { %v5785_v61 = vpop.f32.mrf.mxu0  ;;  %3149 = vmatpush1.bf16.msra.mxu0 %v4486_v56 }
 0x111   :  { %v5787_v62 = vpop.f32.mrf.mxu1  ;;  %3150 = vmatprep.subr.bf16.mxu0 %v4491_v31  ;;  %v4498_v31 = vld [vmem:[%s6656_s3] ss:$8 sps:$4 sm:$0xff]  }
 0x112   :  { %v1800_v8 = vpop.f32.mrf.mxu0  ;;  %2477 = vmatmul.mubr.bf16.gmra.mxu0 %v5226_v40  ;;  %v4530_v40 = vld [vmem:[%s6656_s3 + $0x164] ss:$8 sps:$4 sm:$0xff]  }
 0x113   :  { %v1913_v9 = vpop.f32.mrf.mxu1  ;;  %2590 = vmatmul.mubr.bf16.gmra.mxu1 %v5239_v43  ;;  %v1801_v12 = vadd.f32 %v1800_v8, %v5722_v15  ;;  %2486 = vmatprep.mubr.bf16.mxu0 %v5256_v48  ;;  %v4497_v48 = vld [vmem:[%s6656_s3 + $0x14] ss:$8 sps:$4 sm:$0xff]  }
 0x114   :  { %2599 = vmatprep.mubr.bf16.mxu1 %v4631_v18  ;;  %v1802_v14 = vpop.f32.mrf.mxu0  ;;  %3151 = vmatpush1.bf16.msra.mxu0 %v4489_v63 }
 0x115   :  { %v1915_v17 = vpop.f32.mrf.mxu1  ;;  %v5812_v24 = vadd.f32 %v1913_v9, %v1801_v12  ;;  %v1803_v43 = vadd.f32 %v1802_v14, %v5730_v16  ;;  %3152 = vmatprep.subr.bf16.mxu0 %v4494_v6  ;;  %3257 = vmatprep.subr.bf16.mxu1 %v4530_v40  ;;  %v4501_v14 = vld [vmem:[%s6656_s3 + $0xf0] ss:$8 sps:$4 sm:$0xff]  }
 0x116   :  { %v5821_v27 = vpop.f32.mrf.mxu0  ;;  %3258 = vmatpush1.bf16.msra.mxu1 %v4528_v25  ;;  %v4537_v40 = vld [vmem:[%s6656_s3 + $0x130] ss:$8 sps:$4 sm:$0xff]  }
 0x117   :  { %v5823_v29 = vpop.f32.mrf.mxu1  ;;  %v5825_v30 = vadd.f32 %v1915_v17, %v1803_v43  ;;  %3259 = vmatprep.subr.bf16.mxu1 %v4533_v45  ;;  %v4539_v17 = vld [vmem:[%s6656_s3 + $0x134] ss:$8 sps:$4 sm:$0xff]  }
 0x118   :  { %v5827_v34 = vpop.f32.mrf.mxu0  ;;  %3153 = vmatpush1.bf16.msra.mxu0 %v4492_v23  ;;  %v4506_v23 = vld [vmem:[%s6656_s3 + $0xe4] ss:$8 sps:$4 sm:$0xff]  }
 0x119   :  { %v5829_v20 = vpop.f32.mrf.mxu1  ;;  %3154 = vmatprep.subr.bf16.mxu0 %v4497_v48 }
 0x11a   :  { %v1810_v49 = vpop.f32.mrf.mxu0  ;;  %2487 = vmatmul.mubr.bf16.gmra.mxu0 %v5269_v51  ;;  %v4536_v51 = vld [vmem:[%s6656_s3 + $0x144] ss:$8 sps:$4 sm:$0xff]   ;;  %3260 = vmatpush1.bf16.msra.mxu1 %v4531_v47 }
 0x11b   :  { %v1923_v53 = vpop.f32.mrf.mxu1  ;;  %2600 = vmatmul.mubr.bf16.gmra.mxu1 %v5282_v54  ;;  %v1811_v55 = vadd.f32 %v1810_v49, %v5722_v15  ;;  %2496 = vmatprep.mubr.bf16.mxu0 %v5299_v59  ;;  %v4503_v59 = vld [vmem:[%s6656_s3 + $0xf4] ss:$8 sps:$4 sm:$0xff]   ;;  %v4540_v49 = vld [vmem:[%s6656_s3 + $0x120] ss:$8 sps:$4 sm:$0xff]  }
 0x11c   :  { %2609 = vmatprep.mubr.bf16.mxu1 %v4631_v18  ;;  %v1812_v56 = vpop.f32.mrf.mxu0  ;;  %3155 = vmatpush1.bf16.msra.mxu0 %v4495_v42 }
 0x11d   :  { %v1925_v58 = vpop.f32.mrf.mxu1  ;;  %v5854_v63 = vadd.f32 %v1923_v53, %v1811_v55  ;;  %v1813_v54 = vadd.f32 %v1812_v56, %v5730_v16  ;;  %3156 = vmatprep.subr.bf16.mxu0 %v4500_v46  ;;  %3261 = vmatprep.subr.bf16.mxu1 %v4536_v51  ;;  %v4504_v46 = vld [vmem:[%s6656_s3 + $0xe0] ss:$8 sps:$4 sm:$0xff]   ;;  %v4507_v51 = vld [vmem:[%s6656_s3 + $0xd0] ss:$8 sps:$4 sm:$0xff]  }
 0x11e   :  { %v5863_v6 = vpop.f32.mrf.mxu0  ;;  %3262 = vmatpush1.bf16.msra.mxu1 %v4534_v2  ;;  %v4543_v2 = vld [vmem:[%s6656_s3 + $0x110] ss:$8 sps:$4 sm:$0xff]  }
 0x11f   :  { %v5865_v3 = vpop.f32.mrf.mxu1  ;;  %v5867_v8 = vadd.f32 %v1925_v58, %v1813_v54  ;;  %3263 = vmatprep.subr.bf16.mxu1 %v4539_v17  ;;  %v4545_v54 = vld [vmem:[%s6656_s3 + $0x114] ss:$8 sps:$4 sm:$0xff]  }
 0x120   :  { %v5869_v9 = vpop.f32.mrf.mxu0  ;;  %3157 = vmatpush1.bf16.msra.mxu0 %v4498_v31 }
 0x121   :  { %v5871_v12 = vpop.f32.mrf.mxu1  ;;  %3158 = vmatprep.subr.bf16.mxu0 %v4503_v59  ;;  %v4512_v59 = vld [vmem:[%s6656_s3 + $0xc4] ss:$8 sps:$4 sm:$0xff]  }
 0x122   :  { %v1820_v43 = vpop.f32.mrf.mxu0  ;;  %2497 = vmatmul.mubr.bf16.gmra.mxu0 %v5320_v0  ;;  %v4542_v0 = vld [vmem:[%s6656_s3 + $0x124] ss:$8 sps:$4 sm:$0xff]   ;;  %3264 = vmatpush1.bf16.msra.mxu1 %v4537_v40 }
 0x123   :  { %v1933_v48 = vpop.f32.mrf.mxu1  ;;  %2610 = vmatmul.mubr.bf16.gmra.mxu1 %v5325_v1  ;;  %v1821_v25 = vadd.f32 %v1820_v43, %v5722_v15  ;;  %2506 = vmatprep.mubr.bf16.mxu0 %v5342_v10  ;;  %v4509_v10 = vld [vmem:[%s6656_s3 + $0xd4] ss:$8 sps:$4 sm:$0xff]  }
 0x124   :  { %2619 = vmatprep.mubr.bf16.mxu1 %v4631_v18  ;;  %v1822_v42 = vpop.f32.mrf.mxu0  ;;  %3159 = vmatpush2.bf16.msra.mxu0 %v4501_v14 }
 0x125   :  { %v1935_v45 = vpop.f32.mrf.mxu1  ;;  %v5896_v47 = vadd.f32 %v1933_v48, %v1821_v25  ;;  %v1823_v1 = vadd.f32 %v1822_v42, %v5730_v16  ;;  %3160 = vmatprep.subr.bf16.mxu0 %v4506_v23  ;;  %3265 = vmatprep.subr.bf16.mxu1 %v4542_v0  ;;  %v4510_v48 = vld [vmem:[%s6656_s3 + $0xc0] ss:$8 sps:$4 sm:$0xff]  }
 0x126   :  { %v5905_v53 = vpop.f32.mrf.mxu0  ;;  %3266 = vmatpush1.bf16.msra.mxu1 %v4540_v49  ;;  %v4546_v42 = vld [vmem:[%s6656_s3 + $0x100] ss:$8 sps:$4 sm:$0xff]   ;;  %v4513_v49 = vld [vmem:[%s6656_s3 + $0xb0] ss:$8 sps:$4 sm:$0xff]  }
 0x127   :  { %v5907_v55 = vpop.f32.mrf.mxu1  ;;  %v5909_v56 = vadd.f32 %v1935_v45, %v1823_v1  ;;  %3267 = vmatprep.subr.bf16.mxu1 %v4545_v54  ;;  %v4518_v54 = vld [vmem:[%s6656_s3 + $0xa4] ss:$8 sps:$4 sm:$0xff]  }
 0x128   :  { %v5911_v58 = vpop.f32.mrf.mxu0  ;;  %3161 = vmatpush2.bf16.msra.mxu0 %v4504_v46 }
 0x129   :  { %v5913_v31 = vpop.f32.mrf.mxu1  ;;  %3162 = vmatprep.subr.bf16.mxu0 %v4509_v10 }
 0x12a   :  { %v1830_v14 = vpop.f32.mrf.mxu0  ;;  %2507 = vmatmul.mubr.bf16.gmra.mxu0 %v5363_v19  ;;  %v4548_v19 = vld [vmem:[%s6656_s3 + $0x104] ss:$8 sps:$4 sm:$0xff]   ;;  %3268 = vmatpush1.bf16.msra.mxu1 %v4543_v2 }
 0x12b   :  { %v1943_v17 = vpop.f32.mrf.mxu1  ;;  %2620 = vmatmul.mubr.bf16.gmra.mxu1 %v5368_v22  ;;  %v1831_v23 = vadd.f32 %v1830_v14, %v5722_v15  ;;  %2516 = vmatprep.mubr.bf16.mxu0 %v5385_v28  ;;  %v4515_v28 = vld [vmem:[%s6656_s3 + $0xb4] ss:$8 sps:$4 sm:$0xff]  }
 0x12c   :  { %2629 = vmatprep.mubr.bf16.mxu1 %v4631_v18  ;;  %v1832_v40 = vpop.f32.mrf.mxu0  ;;  %3163 = vmatpush2.bf16.msra.mxu0 %v4507_v51  ;;  %v4551_v51 = vld [vmem:[%s6656_s3 + $0x1f4] ss:$8 sps:$4 sm:$0xff]  }
 0x12d   :  { %v1945_v43 = vpop.f32.mrf.mxu1  ;;  %v5938_v25 = vadd.f32 %v1943_v17, %v1831_v23  ;;  %v1833_v22 = vadd.f32 %v1832_v40, %v5730_v16  ;;  %3164 = vmatprep.subr.bf16.mxu0 %v4512_v59  ;;  %3269 = vmatprep.subr.bf16.mxu1 %v4548_v19  ;;  %v4549_v59 = vld [vmem:[%s6656_s3 + $0x1f0] ss:$8 sps:$4 sm:$0xff]  }
 0x12e   :  { %v5947_v45 = vpop.f32.mrf.mxu0  ;;  %3270 = vmatpush1.bf16.msra.mxu1 %v4546_v42 }
 0x12f   :  { %v5949_v46 = vpop.f32.mrf.mxu1  ;;  %v5951_v0 = vadd.f32 %v1945_v43, %v1833_v22  ;;  %v4516_v43 = vld [vmem:[%s6656_s3 + $0xa0] ss:$8 sps:$4 sm:$0xff]   ;;  %3271 = vmatprep.subr.bf16.mxu1 %v4551_v51  ;;  %v4519_v51 = vld [vmem:[%s6656_s3 + $0x90] ss:$8 sps:$4 sm:$0xff]  }
 0x130   :  { %v5953_v1 = vpop.f32.mrf.mxu0  ;;  %3165 = vmatpush2.bf16.msra.mxu0 %v4510_v48 }
 0x131   :  { %v5955_v10 = vpop.f32.mrf.mxu1  ;;  %3166 = vmatprep.subr.bf16.mxu0 %v4515_v28 }
 0x132   :  { %v1840_v2 = vpop.f32.mrf.mxu0  ;;  %2517 = vmatmul.mubr.bf16.gmra.mxu0 %v5406_v35  ;;  %v4554_v35 = vld [vmem:[%s6656_s3 + $0x1e4] ss:$8 sps:$4 sm:$0xff]   ;;  %3272 = vmatpush2.bf16.msra.mxu1 %v4549_v59 }
 0x133   :  { %v1953_v14 = vpop.f32.mrf.mxu1  ;;  %2630 = vmatmul.mubr.bf16.gmra.mxu1 %v5411_v36  ;;  %v1841_v17 = vadd.f32 %v1840_v2, %v5722_v15  ;;  %2526 = vmatprep.mubr.bf16.mxu0 %v5428_v44  ;;  %v4552_v44 = vld [vmem:[%s6656_s3 + $0x1e0] ss:$8 sps:$4 sm:$0xff]   ;;  %v4524_v59 = vld [vmem:[%s6656_s3 + $0x84] ss:$8 sps:$4 sm:$0xff]   ;;  %v4555_v2 = vld [vmem:[%s6656_s3 + $0x1d0] ss:$8 sps:$4 sm:$0xff]  }
 0x134   :  { %2639 = vmatprep.mubr.bf16.mxu1 %v4631_v18  ;;  %v1842_v23 = vpop.f32.mrf.mxu0  ;;  %3167 = vmatpush2.bf16.msra.mxu0 %v4513_v49  ;;  %v4521_v18 = vld [vmem:[%s6656_s3 + $0x94] ss:$8 sps:$4 sm:$0xff]  }
 0x135   :  { %v1955_v40 = vpop.f32.mrf.mxu1  ;;  %v5980_v48 = vadd.f32 %v1953_v14, %v1841_v17  ;;  %v1843_v36 = vadd.f32 %v1842_v23, %v5730_v16  ;;  %3168 = vmatprep.subr.bf16.mxu0 %v4518_v54  ;;  %3273 = vmatprep.subr.bf16.mxu1 %v4554_v35  ;;  %v4557_v54 = vld [vmem:[%s6656_s3 + $0x1d4] ss:$8 sps:$4 sm:$0xff]   ;;  %v4522_v35 = vld [vmem:[%s6656_s3 + $0x80] ss:$8 sps:$4 sm:$0xff]  }
 0x136   :  { %v5989_v19 = vpop.f32.mrf.mxu0  ;;  %3274 = vmatpush2.bf16.msra.mxu1 %v4552_v44 }
 0x137   :  { %v5991_v22 = vpop.f32.mrf.mxu1  ;;  %v5993_v28 = vadd.f32 %v1955_v40, %v1843_v36  ;;  %3275 = vmatprep.subr.bf16.mxu1 %v4557_v54  ;;  %v4560_v36 = vld [vmem:[%s6656_s3 + $0x1c4] ss:$8 sps:$4 sm:$0xff]  }
 0x138   :  { %v5995_v42 = vpop.f32.mrf.mxu0  ;;  %3169 = vmatpush2.bf16.msra.mxu0 %v4516_v43 }
 0x139   :  { %v5997_v49 = vpop.f32.mrf.mxu1  ;;  %3170 = vmatprep.subr.bf16.mxu0 %v4521_v18 }
 0x13a   :  { %v1850_v14 = vpop.f32.mrf.mxu0  ;;  %2527 = vmatmul.mubr.bf16.gmra.mxu0 %v5449_v50  ;;  %3276 = vmatpush2.bf16.msra.mxu1 %v4555_v2  ;;  %v1785_v2 = vadd.f32 %v5749_v21, %v5722_v15 }
 0x13b   :  { %v1963_v17 = vpop.f32.mrf.mxu1  ;;  %2640 = vmatmul.mubr.bf16.gmra.mxu1 %v5454_v52  ;;  %v1851_v23 = vadd.f32 %v1850_v14, %v5722_v15  ;;  %v4558_v52 = vld [vmem:[%s6656_s3 + $0x1c0] ss:$8 sps:$4 sm:$0xff]   ;;  %3277 = vmatprep.subr.bf16.mxu1 %v4560_v36 }
 0x13c   :  { %v1852_v40 = vpop.f32.mrf.mxu0  ;;  %3171 = vmatpush2.bf16.msra.mxu0 %v4519_v51  ;;  %v1898_v13 = vadd.f32 %v5751_v26, %v1785_v2  ;;  %v4569_v26 = vld [vmem:[%s6656_s3 + $0x194] ss:$8 sps:$4 sm:$0xff]  }
 0x13d   :  { %v1965_v43 = vpop.f32.mrf.mxu1  ;;  %v6020_v18 = vadd.f32 %v1963_v17, %v1851_v23  ;;  %v1853_v50 = vadd.f32 %v1852_v40, %v5730_v16  ;;  %3172 = vmatprep.subr.bf16.mxu0 %v4524_v59  ;;  %v4563_v59 = vld [vmem:[%s6656_s3 + $0x1b4] ss:$8 sps:$4 sm:$0xff]   ;;  %v4561_v17 = vld [vmem:[%s6656_s3 + $0x1b0] ss:$8 sps:$4 sm:$0xff]  }
 0x13e   :  { %v6026_v44 = vpop.f32.mrf.mxu0  ;;  %3278 = vmatpush2.bf16.msra.mxu1 %v4558_v52  ;;  %v4564_v52 = vld [vmem:[%s6656_s3 + $0x1a0] ss:$8 sps:$4 sm:$0xff]  }
 0x13f   :  { %6674 = vst [vmem:[#allocation4_spill] sm:$0xff] %v6020_v18  ;;  %v6028_v51 = vpop.f32.mrf.mxu1  ;;  %v6030_v54 = vadd.f32 %v1965_v43, %v1853_v50  ;;  %3279 = vmatprep.subr.bf16.mxu1 %v4563_v59  ;;  %v1787_v43 = vadd.f32 %v5755_v39, %v5730_v16  ;;  %v4566_v50 = vld [vmem:[%s6656_s3 + $0x1a4] ss:$8 sps:$4 sm:$0xff]  }
 0x140   :  { %6675 = vst [vmem:[#allocation5_spill] sm:$0xff] %v6028_v51  ;;  %v6032_v14 = vpop.f32.mrf.mxu0  ;;  %3173 = vmatpush2.bf16.msra.mxu0 %v4522_v35 }
 0x141   :  { %6676 = vst [vmem:[#allocation6_spill] sm:$0xff] %v6030_v54  ;;  %v6034_v4 = vpop.f32.mrf.mxu1  ;;  %v1900_v39 = vadd.f32 %v5757_v41, %v1787_v43 }
 0x142   :  { %6677 = vst [vmem:[#allocation7_spill] sm:$0xff] %v6034_v4  ;;  %v2006_v23 = vpop.f32.mrf.mxu0  ;;  %3280 = vmatpush2.bf16.msra.mxu1 %v4561_v17 }
 0x143   :  { %v2119_v40 = vpop.f32.mrf.mxu1  ;;  %v2007_v59 = vadd.f32 %v2006_v23, %v5743_v33  ;;  %3281 = vmatprep.subr.bf16.mxu1 %v4566_v50  ;;  %v4567_v33 = vld [vmem:[%s6656_s3 + $0x190] ss:$8 sps:$4 sm:$0xff]  }
 0x144   :  { %v2008_v36 = vpop.f32.mrf.mxu0 }
 0x145   :  { %v2121_v35 = vpop.f32.mrf.mxu1  ;;  %v2009_v21 = vadd.f32 %v2008_v36, %v5753_v38  ;;  %v1795_v38 = vadd.f32 %v5779_v32, %v5722_v15  ;;  %v2120_v23 = vadd.f32 %v2119_v40, %v2007_v59 }
 0x146   :  { %v2010_v7 = vpop.f32.mrf.mxu0  ;;  %3282 = vmatpush2.bf16.msra.mxu1 %v4564_v52 }
 0x147   :  { %v2123_v11 = vpop.f32.mrf.mxu1  ;;  %v2011_v4 = vadd.f32 %v2010_v7, %v1898_v13  ;;  %v2122_v2 = vadd.f32 %v2121_v35, %v2009_v21  ;;  %3283 = vmatprep.subr.bf16.mxu1 %v4569_v26  ;;  %v1797_v13 = vadd.f32 %v5785_v61, %v5730_v16  ;;  %v4570_v35 = vld [vmem:[%s6656_s3 + $0x180] ss:$8 sps:$4 sm:$0xff]   ;;  %v2650_v61 = vmax.f32 %v2120_v23, 0.0 }
 0x148   :  { %v2012_v18 = vpop.f32.mrf.mxu0 }
 0x149   :  { %v2125_v54 = vpop.f32.mrf.mxu1  ;;  %v2124_v17 = vadd.f32 %v2123_v11, %v2011_v4  ;;  %v2013_v36 = vadd.f32 %v2012_v18, %v1900_v39  ;;  %v4572_v4 = vld [vmem:[%s6656_s3 + $0x184] ss:$8 sps:$4 sm:$0xff]   ;;  %v1908_v11 = vadd.f32 %v5781_v37, %v1795_v38  ;;  %v2651_v32 = vmax.f32 %v2122_v2, 0.0 }
 0x14a   :  { %v2016_v41 = vpop.f32.mrf.mxu0  ;;  %3284 = vmatpush2.bf16.msra.mxu1 %v4567_v33  ;;  %v1910_v59 = vadd.f32 %v5787_v62, %v1797_v13  ;;  %v1805_v37 = vadd.f32 %v5821_v27, %v5722_v15  ;;  %v1807_v62 = vadd.f32 %v5827_v34, %v5730_v16 }
 0x14b   :  { %v2129_v7 = vpop.f32.mrf.mxu1  ;;  %v2126_v43 = vadd.f32 %v2125_v54, %v2013_v36  ;;  %v2654_v50 = vmax.f32 %v2124_v17, 0.0  ;;  %v2017_v54 = vadd.f32 %v2016_v41, %v5773_v57  ;;  %3285 = vmatprep.subr.bf16.mxu1 %v4572_v4 }
 0x14c   :  { %v2018_v51 = vpop.f32.mrf.mxu0  ;;  %v1918_v27 = vadd.f32 %v5823_v29, %v1805_v37 }
 0x14d   :  { %v2131_v5 = vpop.f32.mrf.mxu1  ;;  %v2655_v18 = vmax.f32 %v2126_v43, 0.0  ;;  %v2019_v40 = vadd.f32 %v2018_v51, %v5783_v60  ;;  %v2714_v38 = vpack.c.bf16 %v2654_v50, %v2650_v61  ;;  %v2130_v33 = vadd.f32 %v2129_v7, %v2017_v54 }
 0x14e   :  { %v2020_v21 = vpop.f32.mrf.mxu0  ;;  %3286 = vmatpush2.bf16.msra.mxu1 %v4570_v35  ;;  %v1920_v35 = vadd.f32 %v5829_v20, %v1807_v62 }
 0x14f   :  { %v2133_v52 = vpop.f32.mrf.mxu1  ;;  %v2021_v39 = vadd.f32 %v2020_v21, %v1908_v11  ;;  %v2715_v26 = vpack.c.bf16 %v2655_v18, %v2651_v32  ;;  %v2132_v2 = vadd.f32 %v2131_v5, %v2019_v40  ;;  %v2658_v32 = vmax.f32 %v2130_v33, 0.0 }
 0x150   :  { %v2022_v60 = vpop.f32.mrf.mxu0 }
 0x151   :  { %v2135_v51 = vpop.f32.mrf.mxu1  ;;  %v2134_v17 = vadd.f32 %v2133_v52, %v2021_v39  ;;  %v2023_v36 = vadd.f32 %v2022_v60, %v1910_v59  ;;  %3174 = vmatprep.mubr.bf16.mxu0 %v2715_v26  ;;  %v2659_v50 = vmax.f32 %v2132_v2, 0.0  ;;  %v1815_v59 = vadd.f32 %v5863_v6, %v5722_v15 }
 0x152   :  { %v2026_v57 = vpop.f32.mrf.mxu0  ;;  %3175 = vmatmul.mubr.bf16.vlgmr.msra.gmra.mxu0 %v2714_v38 }
 0x153   :  { %v2139_v23 = vpop.f32.mrf.mxu1  ;;  %v2136_v41 = vadd.f32 %v2135_v51, %v2023_v36  ;;  %v2662_v13 = vmax.f32 %v2134_v17, 0.0  ;;  %v2027_v18 = vadd.f32 %v2026_v57, %v5812_v24  ;;  %v1817_v24 = vadd.f32 %v5869_v9, %v5730_v16 }
 0x154   :  { %v2028_v43 = vpop.f32.mrf.mxu0  ;;  %v1928_v17 = vadd.f32 %v5865_v3, %v1815_v59 }
 0x155   :  { %v2141_v4 = vpop.f32.mrf.mxu1  ;;  %v2663_v11 = vmax.f32 %v2136_v41, 0.0  ;;  %v2029_v5 = vadd.f32 %v2028_v43, %v5825_v30  ;;  %v2718_v34 = vpack.c.bf16 %v2662_v13, %v2658_v32  ;;  %v2140_v30 = vadd.f32 %v2139_v23, %v2027_v18 }
 0x156   :  { %v2030_v7 = vpop.f32.mrf.mxu0  ;;  %v1930_v13 = vadd.f32 %v5871_v12, %v1817_v24 }
 0x157   :  { %v2143_v40 = vpop.f32.mrf.mxu1  ;;  %v2031_v61 = vadd.f32 %v2030_v7, %v1918_v27  ;;  %v2719_v54 = vpack.c.bf16 %v2663_v11, %v2659_v50  ;;  %v2142_v29 = vadd.f32 %v2141_v4, %v2029_v5  ;;  %v2666_v57 = vmax.f32 %v2140_v30, 0.0 }
 0x158   :  { %v2032_v21 = vpop.f32.mrf.mxu0  ;;  %v1825_v11 = vadd.f32 %v5905_v53, %v5722_v15 }
 0x159   :  { %v2145_v52 = vpop.f32.mrf.mxu1  ;;  %v2144_v39 = vadd.f32 %v2143_v40, %v2031_v61  ;;  %v2033_v26 = vadd.f32 %v2032_v21, %v1920_v35  ;;  %3184 = vmatprep.mubr.bf16.mxu0 %v2719_v54  ;;  %v2667_v36 = vmax.f32 %v2142_v29, 0.0 }
 0x15a   :  { %v2036_v37 = vpop.f32.mrf.mxu0  ;;  %3185 = vmatmul.mubr.bf16.gmra.mxu0 %v2718_v34  ;;  %v1938_v54 = vadd.f32 %v5907_v55, %v1825_v11 }
 0x15b   :  { %v2149_v38 = vpop.f32.mrf.mxu1  ;;  %v2146_v20 = vadd.f32 %v2145_v52, %v2033_v26  ;;  %v2670_v60 = vmax.f32 %v2144_v39, 0.0  ;;  %v2037_v62 = vadd.f32 %v2036_v37, %v5854_v63  ;;  %v1827_v63 = vadd.f32 %v5911_v58, %v5730_v16 }
 0x15c   :  { %v2038_v51 = vpop.f32.mrf.mxu0 }
 0x15d   :  { %v2151_v2 = vpop.f32.mrf.mxu1  ;;  %v2671_v33 = vmax.f32 %v2146_v20, 0.0  ;;  %v2039_v6 = vadd.f32 %v2038_v51, %v5867_v8  ;;  %v2722_v9 = vpack.c.bf16 %v2670_v60, %v2666_v57  ;;  %v2150_v8 = vadd.f32 %v2149_v38, %v2037_v62 }
 0x15e   :  { %v2040_v23 = vpop.f32.mrf.mxu0  ;;  %v1940_v26 = vadd.f32 %v5913_v31, %v1827_v63  ;;  %v1835_v20 = vadd.f32 %v5947_v45, %v5722_v15 }
 0x15f   :  { %v2153_v41 = vpop.f32.mrf.mxu1  ;;  %v2041_v43 = vadd.f32 %v2040_v23, %v1928_v17  ;;  %v2723_v4 = vpack.c.bf16 %v2671_v33, %v2667_v36  ;;  %v2152_v3 = vadd.f32 %v2151_v2, %v2039_v6  ;;  %v2674_v52 = vmax.f32 %v2150_v8, 0.0 }
 0x160   :  { %v2042_v27 = vpop.f32.mrf.mxu0  ;;  %v1948_v57 = vadd.f32 %v5949_v46, %v1835_v20 }
 0x161   :  { %v2155_v50 = vpop.f32.mrf.mxu1  ;;  %v2154_v5 = vadd.f32 %v2153_v41, %v2041_v43  ;;  %v2043_v32 = vadd.f32 %v2042_v27, %v1930_v13  ;;  %3194 = vmatprep.mubr.bf16.mxu0 %v2723_v4  ;;  %v2675_v34 = vmax.f32 %v2152_v3, 0.0 }
 0x162   :  { %v2046_v18 = vpop.f32.mrf.mxu0  ;;  %3195 = vmatmul.mubr.bf16.gmra.mxu0 %v2722_v9 }
 0x163   :  { %v2159_v7 = vpop.f32.mrf.mxu1  ;;  %v2156_v12 = vadd.f32 %v2155_v50, %v2043_v32  ;;  %v2678_v40 = vmax.f32 %v2154_v5, 0.0  ;;  %v2047_v59 = vadd.f32 %v2046_v18, %v5896_v47  ;;  %v1837_v47 = vadd.f32 %v5953_v1, %v5730_v16 }
 0x164   :  { %v2048_v35 = vpop.f32.mrf.mxu0  ;;  %v1845_v5 = vadd.f32 %v5989_v19, %v5722_v15 }
 0x165   :  { %v2161_v61 = vpop.f32.mrf.mxu1  ;;  %v2679_v21 = vmax.f32 %v2156_v12, 0.0  ;;  %v2049_v53 = vadd.f32 %v2048_v35, %v5909_v56  ;;  %v2726_v58 = vpack.c.bf16 %v2678_v40, %v2674_v52  ;;  %v2160_v56 = vadd.f32 %v2159_v7, %v2047_v59 }
 0x166   :  { %v2050_v29 = vpop.f32.mrf.mxu0  ;;  %v1950_v9 = vadd.f32 %v5955_v10, %v1837_v47  ;;  %v1958_v35 = vadd.f32 %v5991_v22, %v1845_v5 }
 0x167   :  { %v2163_v39 = vpop.f32.mrf.mxu1  ;;  %v2051_v30 = vadd.f32 %v2050_v29, %v1938_v54  ;;  %v2727_v37 = vpack.c.bf16 %v2679_v21, %v2675_v34  ;;  %v2162_v55 = vadd.f32 %v2161_v61, %v2049_v53  ;;  %v2682_v41 = vmax.f32 %v2160_v56, 0.0 }
 0x168   :  { %v2052_v38 = vpop.f32.mrf.mxu0 }
 0x169   :  { %v2165_v24 = vpop.f32.mrf.mxu1  ;;  %v2164_v60 = vadd.f32 %v2163_v39, %v2051_v30  ;;  %v2053_v51 = vadd.f32 %v2052_v38, %v1940_v26  ;;  %3204 = vmatprep.mubr.bf16.mxu0 %v2727_v37  ;;  %v2683_v62 = vmax.f32 %v2162_v55, 0.0  ;;  %v1855_v37 = vadd.f32 %v6026_v44, %v5722_v15  ;;  %v6678_v55 = vld [vmem:[#allocation2_spill] sm:$0xff]  ;;  %v6679_v15 = vld [vmem:[#allocation5_spill] sm:$0xff] }
 0x16a   :  { %v2056_v2 = vpop.f32.mrf.mxu0  ;;  %3205 = vmatmul.mubr.bf16.gmra.mxu0 %v2726_v58 }
 0x16b   :  { %v2169_v17 = vpop.f32.mrf.mxu1  ;;  %v2166_v31 = vadd.f32 %v2165_v24, %v2053_v51  ;;  %v2686_v36 = vmax.f32 %v2164_v60, 0.0  ;;  %v2057_v13 = vadd.f32 %v2056_v2, %v5938_v25  ;;  %v1847_v25 = vadd.f32 %v5995_v42, %v5730_v16 }
 0x16c   :  { %v2058_v33 = vpop.f32.mrf.mxu0  ;;  %v328_v60 = vsub.s32 2, %v6678_v55  ;;  %v1968_v44 = vadd.f32 %v6679_v15, %v1855_v37 }
 0x16d   :  { %v2171_v6 = vpop.f32.mrf.mxu1  ;;  %v2687_v23 = vmax.f32 %v2166_v31, 0.0  ;;  %v2059_v45 = vadd.f32 %v2058_v33, %v5951_v0  ;;  %v2730_v1 = vpack.c.bf16 %v2686_v36, %v2682_v41  ;;  %v2170_v0 = vadd.f32 %v2169_v17, %v2057_v13  ;;  %v6680_v36 = vld [vmem:[#allocation6_spill] sm:$0xff] }
 0x16e   :  { %v2060_v43 = vpop.f32.mrf.mxu0  ;;  %v1960_v59 = vadd.f32 %v5997_v49, %v1847_v25  ;;  %v332_v17 = vsub.s32 3, %v6678_v55 }
 0x16f   :  { %v2173_v4 = vpop.f32.mrf.mxu1  ;;  %v2731_v27 = vpack.c.bf16 %v2687_v23, %v2683_v62  ;;  %v2061_v50 = vadd.f32 %v2060_v43, %v1948_v57  ;;  %v2172_v46 = vadd.f32 %v2171_v6, %v2059_v45  ;;  %v2690_v34 = vmax.f32 %v2170_v0, 0.0  ;;  %v6681_v57 = vld [vmem:[#allocation4_spill] sm:$0xff]  ;;  %v6683_v43 = vld [vmem:[#allocation3_spill] sm:$0xff] }
 0x170   :  { %v2062_v11 = vpop.f32.mrf.mxu0  ;;  %v6130_v5 = vrot.slane %v6683_v43, %v332_v17 }
 0x171   :  { %v2175_v3 = vpop.f32.mrf.mxu1  ;;  %v2174_v32 = vadd.f32 %v2173_v4, %v2061_v50  ;;  %v2063_v8 = vadd.f32 %v2062_v11, %v1950_v9  ;;  %3214 = vmatprep.mubr.bf16.mxu0 %v2731_v27  ;;  %v2691_v61 = vmax.f32 %v2172_v46, 0.0  ;;  %v6127_v4 = vrot.slane %v6683_v43, %v328_v60 }
 0x172   :  { %v2066_v18 = vpop.f32.mrf.mxu0  ;;  %3215 = vmatmul.mubr.bf16.gmra.mxu0 %v2730_v1 }
 0x173   :  { %v2179_v7 = vpop.f32.mrf.mxu1  ;;  %v2176_v10 = vadd.f32 %v2175_v3, %v2063_v8  ;;  %v2694_v63 = vmax.f32 %v2174_v32, 0.0  ;;  %v2067_v21 = vadd.f32 %v2066_v18, %v5980_v48  ;;  %v1857_v48 = vadd.f32 %v6032_v14, %v5730_v16  ;;  %v6682_v16 = vld [vmem:[#allocation7_spill] sm:$0xff] }
 0x174   :  { %v2068_v12 = vpop.f32.mrf.mxu0 }
 0x175   :  { %v2181_v40 = vpop.f32.mrf.mxu1  ;;  %v2695_v54 = vmax.f32 %v2176_v10, 0.0  ;;  %v2069_v19 = vadd.f32 %v2068_v12, %v5993_v28  ;;  %v2734_v42 = vpack.c.bf16 %v2694_v63, %v2690_v34  ;;  %v2180_v28 = vadd.f32 %v2179_v7, %v2067_v21 }
 0x176   :  { %v2070_v53 = vpop.f32.mrf.mxu0  ;;  %v1970_v14 = vadd.f32 %v6682_v16, %v1857_v48 }
 0x177   :  { %v2183_v52 = vpop.f32.mrf.mxu1  ;;  %v2735_v29 = vpack.c.bf16 %v2695_v54, %v2691_v61  ;;  %v2071_v39 = vadd.f32 %v2070_v53, %v1958_v35  ;;  %v2182_v22 = vadd.f32 %v2181_v40, %v2069_v19  ;;  %v2698_v6 = vmax.f32 %v2180_v28, 0.0 }
 0x178   :  { %v2072_v26 = vpop.f32.mrf.mxu0 }
 0x179   :  { %v2185_v30 = vpop.f32.mrf.mxu1  ;;  %v2184_v58 = vadd.f32 %v2183_v52, %v2071_v39  ;;  %v2073_v38 = vadd.f32 %v2072_v26, %v1960_v59  ;;  %3224 = vmatprep.mubr.bf16.mxu0 %v2735_v29  ;;  %v2699_v47 = vmax.f32 %v2182_v22, 0.0 }
 0x17a   :  { %v2076_v24 = vpop.f32.mrf.mxu0  ;;  %3225 = vmatmul.mubr.bf16.gmra.mxu0 %v2734_v42 }
 0x17b   :  { %v2189_v20 = vpop.f32.mrf.mxu1  ;;  %v2186_v49 = vadd.f32 %v2185_v30, %v2073_v38  ;;  %v2702_v51 = vmax.f32 %v2184_v58, 0.0  ;;  %v2077_v62 = vadd.f32 %v2076_v24, %v6681_v57 }
 0x17c   :  { %v2078_v56 = vpop.f32.mrf.mxu0 }
 0x17d   :  { %v2191_v2 = vpop.f32.mrf.mxu1  ;;  %v2703_v31 = vmax.f32 %v2186_v49, 0.0  ;;  %v2079_v33 = vadd.f32 %v2078_v56, %v6680_v36  ;;  %v2738_v9 = vpack.c.bf16 %v2702_v51, %v2698_v6  ;;  %v2190_v46 = vadd.f32 %v2189_v20, %v2077_v62 }
 0x17e   :  { %v2080_v23 = vpop.f32.mrf.mxu0 }
 0x17f   :  { %v2193_v45 = vpop.f32.mrf.mxu1  ;;  %v2739_v41 = vpack.c.bf16 %v2703_v31, %v2699_v47  ;;  %v2081_v13 = vadd.f32 %v2080_v23, %v1968_v44  ;;  %v2192_v1 = vadd.f32 %v2191_v2, %v2079_v33  ;;  %v2706_v61 = vmax.f32 %v2190_v46, 0.0 }
 0x180   :  { %v2082_v27 = vpop.f32.mrf.mxu0 }
 0x181   :  { %v2195_v50 = vpop.f32.mrf.mxu1  ;;  %v2194_v11 = vadd.f32 %v2193_v45, %v2081_v13  ;;  %v2083_v3 = vadd.f32 %v2082_v27, %v1970_v14  ;;  %3234 = vmatprep.mubr.bf16.mxu0 %v2739_v41  ;;  %v2707_v63 = vmax.f32 %v2192_v1, 0.0 }
 0x182   :  { %v2232_v32 = vpop.f32.mrf.mxu0  ;;  %3235 = vmatmul.mubr.bf16.gmra.mxu0 %v2738_v9 }
 0x183   :  { %v2345_v8 = vpop.f32.mrf.mxu1  ;;  %v2196_v0 = vadd.f32 %v2195_v50, %v2083_v3  ;;  %v2233_v18 = vadd.f32 %v2232_v32, %v6127_v4  ;;  %v2710_v7 = vmax.f32 %v2194_v11, 0.0 }
 0x184   :  { %v2234_v25 = vpop.f32.mrf.mxu0 }
 0x185   :  { %v2347_v10 = vpop.f32.mrf.mxu1  ;;  %v2711_v12 = vmax.f32 %v2196_v0, 0.0  ;;  %v6133_v40 = vadd.f32 %v2345_v8, %v2233_v18  ;;  %v2235_v35 = vadd.f32 %v2234_v25, %v6130_v5  ;;  %v2742_v53 = vpack.c.bf16 %v2710_v7, %v2706_v61 }
 0x186   :  { %v6136_v54 = vpop.f32.mrf.mxu0 }
 0x187   :  { %v6138_v19 = vpop.f32.mrf.mxu1  ;;  %v2743_v34 = vpack.c.bf16 %v2711_v12, %v2707_v63  ;;  %v6140_v21 = vadd.f32 %v2347_v10, %v2235_v35 }
 0x188   :  { %v6142_v52 = vpop.f32.mrf.mxu0 }
 0x189   :  { %v6144_v59 = vpop.f32.mrf.mxu1  ;;  %3244 = vmatprep.mubr.bf16.mxu0 %v2743_v34 }
 0x18a   :  { %v2242_v29 = vpop.f32.mrf.mxu0  ;;  %3245 = vmatmul.mubr.bf16.gmra.mxu0 %v2742_v53 }
 0x18b   :  { %v2355_v39 = vpop.f32.mrf.mxu1  ;;  %v2243_v42 = vadd.f32 %v2242_v29, %v6127_v4 }
 0x18c   :  { %v2244_v26 = vpop.f32.mrf.mxu0 }
 0x18d   :  { %v2357_v30 = vpop.f32.mrf.mxu1  ;;  %v6147_v37 = vadd.f32 %v2355_v39, %v2243_v42  ;;  %v2245_v22 = vadd.f32 %v2244_v26, %v6130_v5 }
 0x18e   :  { %v6150_v58 = vpop.f32.mrf.mxu0 }
 0x18f   :  { %v6152_v38 = vpop.f32.mrf.mxu1  ;;  %v6154_v28 = vadd.f32 %v2357_v30, %v2245_v22 }
 0x190   :  { %v6156_v24 = vpop.f32.mrf.mxu0 }
 0x191   :  { %v6158_v20 = vpop.f32.mrf.mxu1 }
 0x192   :  { %v2252_v48 = vpop.f32.mrf.mxu0 }
 0x193   :  { %v2365_v49 = vpop.f32.mrf.mxu1  ;;  %v2253_v60 = vadd.f32 %v2252_v48, %v6127_v4 }
 0x194   :  { %v2254_v51 = vpop.f32.mrf.mxu0 }
 0x195   :  { %v2367_v56 = vpop.f32.mrf.mxu1  ;;  %v6161_v2 = vadd.f32 %v2365_v49, %v2253_v60  ;;  %v2255_v17 = vadd.f32 %v2254_v51, %v6130_v5 }
 0x196   :  { %v6164_v15 = vpop.f32.mrf.mxu0 }
 0x197   :  { %v6166_v44 = vpop.f32.mrf.mxu1  ;;  %v6168_v47 = vadd.f32 %v2367_v56, %v2255_v17 }
 0x198   :  { %v6170_v31 = vpop.f32.mrf.mxu0 }
 0x199   :  { %v6172_v36 = vpop.f32.mrf.mxu1 }
 0x19a   :  { %v2262_v33 = vpop.f32.mrf.mxu0 }
 0x19b   :  { %v2375_v6 = vpop.f32.mrf.mxu1  ;;  %v2263_v57 = vadd.f32 %v2262_v33, %v6127_v4 }
 0x19c   :  { %v2264_v62 = vpop.f32.mrf.mxu0 }
 0x19d   :  { %v2377_v23 = vpop.f32.mrf.mxu1  ;;  %v6175_v45 = vadd.f32 %v2375_v6, %v2263_v57  ;;  %v2265_v16 = vadd.f32 %v2264_v62, %v6130_v5 }
 0x19e   :  { %v6178_v14 = vpop.f32.mrf.mxu0 }
 0x19f   :  { %v6180_v41 = vpop.f32.mrf.mxu1  ;;  %v6182_v13 = vadd.f32 %v2377_v23, %v2265_v16 }
 0x1a0   :  { %v6184_v43 = vpop.f32.mrf.mxu0 }
 0x1a1   :  { %v6186_v9 = vpop.f32.mrf.mxu1 }
 0x1a2   :  { %v2272_v27 = vpop.f32.mrf.mxu0 }
 0x1a3   :  { %v2385_v50 = vpop.f32.mrf.mxu1  ;;  %v2273_v1 = vadd.f32 %v2272_v27, %v6127_v4 }
 0x1a4   :  { %v2274_v11 = vpop.f32.mrf.mxu0 }
 0x1a5   :  { %v2387_v3 = vpop.f32.mrf.mxu1  ;;  %v6189_v46 = vadd.f32 %v2385_v50, %v2273_v1  ;;  %v2275_v32 = vadd.f32 %v2274_v11, %v6130_v5 }
 0x1a6   :  { %v6192_v8 = vpop.f32.mrf.mxu0 }
 0x1a7   :  { %v6194_v0 = vpop.f32.mrf.mxu1  ;;  %v6196_v18 = vadd.f32 %v2387_v3, %v2275_v32 }
 0x1a8   :  { %v6198_v7 = vpop.f32.mrf.mxu0 }
 0x1a9   :  { %v6200_v25 = vpop.f32.mrf.mxu1 }
 0x1aa   :  { %v2282_v10 = vpop.f32.mrf.mxu0 }
 0x1ab   :  { %v2395_v63 = vpop.f32.mrf.mxu1  ;;  %v2283_v12 = vadd.f32 %v2282_v10, %v6127_v4 }
 0x1ac   :  { %v2284_v35 = vpop.f32.mrf.mxu0 }
 0x1ad   :  { %v2397_v61 = vpop.f32.mrf.mxu1  ;;  %v6203_v34 = vadd.f32 %v2395_v63, %v2283_v12  ;;  %v2285_v53 = vadd.f32 %v2284_v35, %v6130_v5 }
 0x1ae   :  { %v6206_v29 = vpop.f32.mrf.mxu0 }
 0x1af   :  { %v6208_v39 = vpop.f32.mrf.mxu1  ;;  %v6210_v42 = vadd.f32 %v2397_v61, %v2285_v53  ;;  %v2237_v53 = vadd.f32 %v6136_v54, %v6127_v4 }
 0x1b0   :  { %v6212_v26 = vpop.f32.mrf.mxu0 }
 0x1b1   :  { %v6214_v30 = vpop.f32.mrf.mxu1 }
 0x1b2   :  { %v2292_v22 = vpop.f32.mrf.mxu0 }
 0x1b3   :  { %v2405_v48 = vpop.f32.mrf.mxu1  ;;  %v2293_v49 = vadd.f32 %v2292_v22, %v6127_v4 }
 0x1b4   :  { %v2294_v60 = vpop.f32.mrf.mxu0 }
 0x1b5   :  { %v2407_v51 = vpop.f32.mrf.mxu1  ;;  %v6217_v56 = vadd.f32 %v2405_v48, %v2293_v49  ;;  %v2295_v17 = vadd.f32 %v2294_v60, %v6130_v5  ;;  %v2239_v49 = vadd.f32 %v6142_v52, %v6130_v5 }
 0x1b6   :  { %v6220_v33 = vpop.f32.mrf.mxu0 }
 0x1b7   :  { %v6222_v6 = vpop.f32.mrf.mxu1  ;;  %v6224_v57 = vadd.f32 %v2407_v51, %v2295_v17  ;;  %v2350_v17 = vadd.f32 %v6138_v19, %v2237_v53 }
 0x1b8   :  { %v6226_v62 = vpop.f32.mrf.mxu0 }
 0x1b9   :  { %v6228_v23 = vpop.f32.mrf.mxu1 }
 0x1ba   :  { %v2302_v16 = vpop.f32.mrf.mxu0 }
 0x1bb   :  { %v2415_v27 = vpop.f32.mrf.mxu1  ;;  %v2303_v50 = vadd.f32 %v2302_v16, %v6127_v4 }
 0x1bc   :  { %v2304_v1 = vpop.f32.mrf.mxu0 }
 0x1bd   :  { %v2417_v11 = vpop.f32.mrf.mxu1  ;;  %v6231_v3 = vadd.f32 %v2415_v27, %v2303_v50  ;;  %v2305_v32 = vadd.f32 %v2304_v1, %v6130_v5 }
 0x1be   :  { %v6234_v10 = vpop.f32.mrf.mxu0 }
 0x1bf   :  { %6684 = vst [vmem:[#allocation5_spill] sm:$0xff] %v6231_v3  ;;  %v6236_v63 = vpop.f32.mrf.mxu1  ;;  %v6238_v12 = vadd.f32 %v2417_v11, %v2305_v32  ;;  %v2352_v11 = vadd.f32 %v6144_v59, %v2239_v49 }
 0x1c0   :  { %6685 = vst [vmem:[#allocation6_spill] sm:$0xff] %v6236_v63  ;;  %v6240_v35 = vpop.f32.mrf.mxu0 }
 0x1c1   :  { %6686 = vst [vmem:[#allocation4_spill] sm:$0xff] %v6238_v12  ;;  %6687 = vst [vmem:[#allocation7_spill] sm:$0xff] %v6240_v35  ;;  %v6242_v61 = vpop.f32.mrf.mxu1 }
 0x1c2   :  { %6688 = vst [vmem:[#allocation3_spill] sm:$0xff] %v6242_v61  ;;  %v2458_v22 = vpop.f32.mrf.mxu0  ;;  %v2247_v61 = vadd.f32 %v6150_v58, %v6127_v4 }
 0x1c3   :  { %v2571_v48 = vpop.f32.mrf.mxu1  ;;  %v2459_v27 = vadd.f32 %v2458_v22, %v6133_v40 }
 0x1c4   :  { %v2460_v60 = vpop.f32.mrf.mxu0  ;;  %v2360_v59 = vadd.f32 %v6152_v38, %v2247_v61 }
 0x1c5   :  { %v2573_v51 = vpop.f32.mrf.mxu1  ;;  %v2461_v16 = vadd.f32 %v2460_v60, %v6140_v21  ;;  %v2572_v63 = vadd.f32 %v2571_v48, %v2459_v27  ;;  %v2249_v21 = vadd.f32 %v6156_v24, %v6130_v5 }
 0x1c6   :  { %v2462_v50 = vpop.f32.mrf.mxu0 }
 0x1c7   :  { %v2575_v1 = vpop.f32.mrf.mxu1  ;;  %v2463_v32 = vadd.f32 %v2462_v50, %v2350_v17  ;;  %v2574_v3 = vadd.f32 %v2573_v51, %v2461_v16  ;;  %v2652_v58 = vmax.f32 %v2572_v63, 0.0  ;;  %v2362_v16 = vadd.f32 %v6158_v20, %v2249_v21 }
 0x1c8   :  { %v2464_v55 = vpop.f32.mrf.mxu0 }
 0x1c9   :  { %v2577_v54 = vpop.f32.mrf.mxu1  ;;  %v2576_v52 = vadd.f32 %v2575_v1, %v2463_v32  ;;  %v2465_v12 = vadd.f32 %v2464_v55, %v2352_v11  ;;  %v2653_v49 = vmax.f32 %v2574_v3, 0.0  ;;  %v2257_v32 = vadd.f32 %v6164_v15, %v6127_v4 }
 0x1ca   :  { %v2468_v35 = vpop.f32.mrf.mxu0 }
 0x1cb   :  { %v2581_v19 = vpop.f32.mrf.mxu1  ;;  %v2578_v40 = vadd.f32 %v2577_v54, %v2465_v12  ;;  %v2656_v53 = vmax.f32 %v2576_v52, 0.0  ;;  %v2469_v51 = vadd.f32 %v2468_v35, %v6147_v37  ;;  %v2259_v37 = vadd.f32 %v6170_v31, %v6130_v5 }
 0x1cc   :  { %v2470_v22 = vpop.f32.mrf.mxu0 }
 0x1cd   :  { %v2583_v60 = vpop.f32.mrf.mxu1  ;;  %v2657_v17 = vmax.f32 %v2578_v40, 0.0  ;;  %v2471_v50 = vadd.f32 %v2470_v22, %v6154_v28  ;;  %v2716_v24 = vpack.c.bf16 %v2656_v53, %v2652_v58  ;;  %v2582_v28 = vadd.f32 %v2581_v19, %v2469_v51 }
 0x1ce   :  { %v2472_v55 = vpop.f32.mrf.mxu0  ;;  %v2370_v40 = vadd.f32 %v6166_v44, %v2257_v32 }
 0x1cf   :  { %v2585_v48 = vpop.f32.mrf.mxu1  ;;  %v2717_v27 = vpack.c.bf16 %v2657_v17, %v2653_v49  ;;  %v2473_v1 = vadd.f32 %v2472_v55, %v2360_v59  ;;  %v2584_v38 = vadd.f32 %v2583_v60, %v2471_v50  ;;  %v2660_v60 = vmax.f32 %v2582_v28, 0.0 }
 0x1d0   :  { %v2474_v12 = vpop.f32.mrf.mxu0  ;;  %v2372_v17 = vadd.f32 %v6172_v36, %v2259_v37 }
 0x1d1   :  { %v2587_v11 = vpop.f32.mrf.mxu1  ;;  %v2586_v3 = vadd.f32 %v2585_v48, %v2473_v1  ;;  %v2475_v61 = vadd.f32 %v2474_v12, %v2362_v16  ;;  %3287 = vmatprep.mubr.bf16.mxu1 %v2717_v27  ;;  %v2661_v53 = vmax.f32 %v2584_v38, 0.0  ;;  %v2267_v48 = vadd.f32 %v6178_v14, %v6127_v4 }
 0x1d2   :  { %v2478_v63 = vpop.f32.mrf.mxu0  ;;  %3288 = vmatmul.mubr.bf16.vlgmr.msra.gmra.mxu1 %v2716_v24 }
 0x1d3   :  { %v2591_v54 = vpop.f32.mrf.mxu1  ;;  %v2588_v20 = vadd.f32 %v2587_v11, %v2475_v61  ;;  %v2664_v35 = vmax.f32 %v2586_v3, 0.0  ;;  %v2479_v59 = vadd.f32 %v2478_v63, %v6161_v2  ;;  %v2269_v2 = vadd.f32 %v6184_v43, %v6130_v5 }
 0x1d4   :  { %v2480_v52 = vpop.f32.mrf.mxu0  ;;  %v2380_v38 = vadd.f32 %v6180_v41, %v2267_v48 }
 0x1d5   :  { %v2593_v21 = vpop.f32.mrf.mxu1  ;;  %v2665_v22 = vmax.f32 %v2588_v20, 0.0  ;;  %v2481_v15 = vadd.f32 %v2480_v52, %v6168_v47  ;;  %v2720_v31 = vpack.c.bf16 %v2664_v35, %v2660_v60  ;;  %v2592_v47 = vadd.f32 %v2591_v54, %v2479_v59 }
 0x1d6   :  { %v2482_v19 = vpop.f32.mrf.mxu0  ;;  %v2382_v20 = vadd.f32 %v6186_v9, %v2269_v2  ;;  %v2287_v2 = vadd.f32 %v6206_v29, %v6127_v4 }
 0x1d7   :  { %v2595_v49 = vpop.f32.mrf.mxu1  ;;  %v2721_v50 = vpack.c.bf16 %v2665_v22, %v2661_v53  ;;  %v2483_v58 = vadd.f32 %v2482_v19, %v2370_v40  ;;  %v2594_v44 = vadd.f32 %v2593_v21, %v2481_v15  ;;  %v2668_v28 = vmax.f32 %v2592_v47, 0.0 }
 0x1d8   :  { %v2484_v51 = vpop.f32.mrf.mxu0  ;;  %v2277_v53 = vadd.f32 %v6192_v8, %v6127_v4 }
 0x1d9   :  { %v2597_v55 = vpop.f32.mrf.mxu1  ;;  %v2596_v16 = vadd.f32 %v2595_v49, %v2483_v58  ;;  %v2485_v27 = vadd.f32 %v2484_v51, %v2372_v17  ;;  %3297 = vmatprep.mubr.bf16.mxu1 %v2721_v50  ;;  %v2669_v3 = vmax.f32 %v2594_v44, 0.0 }
 0x1da   :  { %v2488_v1 = vpop.f32.mrf.mxu0  ;;  %3298 = vmatmul.mubr.bf16.gmra.mxu1 %v2720_v31  ;;  %v2390_v50 = vadd.f32 %v6194_v0, %v2277_v53 }
 0x1db   :  { %v2601_v24 = vpop.f32.mrf.mxu1  ;;  %v2598_v36 = vadd.f32 %v2597_v55, %v2485_v27  ;;  %v2672_v12 = vmax.f32 %v2596_v16, 0.0  ;;  %v2489_v63 = vadd.f32 %v2488_v1, %v6175_v45  ;;  %v2279_v45 = vadd.f32 %v6198_v7, %v6130_v5 }
 0x1dc   :  { %v2490_v11 = vpop.f32.mrf.mxu0 }
 0x1dd   :  { %v2603_v32 = vpop.f32.mrf.mxu1  ;;  %v2673_v61 = vmax.f32 %v2598_v36, 0.0  ;;  %v2491_v14 = vadd.f32 %v2490_v11, %v6182_v13  ;;  %v2724_v43 = vpack.c.bf16 %v2672_v12, %v2668_v28  ;;  %v2602_v13 = vadd.f32 %v2601_v24, %v2489_v63 }
 0x1de   :  { %v2492_v54 = vpop.f32.mrf.mxu0  ;;  %v2392_v16 = vadd.f32 %v6200_v25, %v2279_v45 }
 0x1df   :  { %v2605_v37 = vpop.f32.mrf.mxu1  ;;  %v2725_v35 = vpack.c.bf16 %v2673_v61, %v2669_v3  ;;  %v2493_v52 = vadd.f32 %v2492_v54, %v2380_v38  ;;  %v2604_v41 = vadd.f32 %v2603_v32, %v2491_v14  ;;  %v2676_v51 = vmax.f32 %v2602_v13, 0.0 }
 0x1e0   :  { %v2494_v21 = vpop.f32.mrf.mxu0  ;;  %v2400_v14 = vadd.f32 %v6208_v39, %v2287_v2 }
 0x1e1   :  { %v2607_v40 = vpop.f32.mrf.mxu1  ;;  %v2606_v22 = vadd.f32 %v2605_v37, %v2493_v52  ;;  %v2495_v15 = vadd.f32 %v2494_v21, %v2382_v20  ;;  %3307 = vmatprep.mubr.bf16.mxu1 %v2725_v35  ;;  %v2677_v58 = vmax.f32 %v2604_v41, 0.0  ;;  %v2297_v41 = vadd.f32 %v6220_v33, %v6127_v4 }
 0x1e2   :  { %v2498_v60 = vpop.f32.mrf.mxu0  ;;  %3308 = vmatmul.mubr.bf16.gmra.mxu1 %v2724_v43 }
 0x1e3   :  { %v2611_v59 = vpop.f32.mrf.mxu1  ;;  %v2608_v9 = vadd.f32 %v2607_v40, %v2495_v15  ;;  %v2680_v19 = vmax.f32 %v2606_v22, 0.0  ;;  %v2499_v55 = vadd.f32 %v2498_v60, %v6189_v46  ;;  %v2289_v46 = vadd.f32 %v6212_v26, %v6130_v5 }
 0x1e4   :  { %v2500_v49 = vpop.f32.mrf.mxu0 }
 0x1e5   :  { %v2613_v17 = vpop.f32.mrf.mxu1  ;;  %v2681_v31 = vmax.f32 %v2608_v9, 0.0  ;;  %v2501_v8 = vadd.f32 %v2500_v49, %v6196_v18  ;;  %v2728_v7 = vpack.c.bf16 %v2680_v19, %v2676_v51  ;;  %v2612_v18 = vadd.f32 %v2611_v59, %v2499_v55 }
 0x1e6   :  { %v2502_v48 = vpop.f32.mrf.mxu0  ;;  %v2402_v52 = vadd.f32 %v6214_v30, %v2289_v46  ;;  %v2410_v19 = vadd.f32 %v6222_v6, %v2297_v41 }
 0x1e7   :  { %v2615_v44 = vpop.f32.mrf.mxu1  ;;  %v2729_v27 = vpack.c.bf16 %v2681_v31, %v2677_v58  ;;  %v2503_v47 = vadd.f32 %v2502_v48, %v2390_v50  ;;  %v2614_v0 = vadd.f32 %v2613_v17, %v2501_v8  ;;  %v2684_v54 = vmax.f32 %v2612_v18, 0.0  ;;  %v6690_v18 = vld [vmem:[#allocation6_spill] sm:$0xff] }
 0x1e8   :  { %v2504_v1 = vpop.f32.mrf.mxu0 }
 0x1e9   :  { %v2617_v24 = vpop.f32.mrf.mxu1  ;;  %v2616_v36 = vadd.f32 %v2615_v44, %v2503_v47  ;;  %v2505_v12 = vadd.f32 %v2504_v1, %v2392_v16  ;;  %3317 = vmatprep.mubr.bf16.mxu1 %v2729_v27  ;;  %v2685_v28 = vmax.f32 %v2614_v0, 0.0  ;;  %v2307_v27 = vadd.f32 %v6234_v10, %v6127_v4  ;;  %v6691_v4 = vld [vmem:[#allocation4_spill] sm:$0xff] }
 0x1ea   :  { %v2508_v11 = vpop.f32.mrf.mxu0  ;;  %3318 = vmatmul.mubr.bf16.gmra.mxu1 %v2728_v7 }
 0x1eb   :  { %v2621_v32 = vpop.f32.mrf.mxu1  ;;  %v2618_v25 = vadd.f32 %v2617_v24, %v2505_v12  ;;  %v2688_v38 = vmax.f32 %v2616_v36, 0.0  ;;  %v2509_v37 = vadd.f32 %v2508_v11, %v6203_v34  ;;  %v2299_v34 = vadd.f32 %v6226_v62, %v6130_v5 }
 0x1ec   :  { %v2510_v3 = vpop.f32.mrf.mxu0  ;;  %v2420_v11 = vadd.f32 %v6690_v18, %v2307_v27 }
 0x1ed   :  { %v2623_v61 = vpop.f32.mrf.mxu1  ;;  %v2689_v63 = vmax.f32 %v2618_v25, 0.0  ;;  %v2511_v29 = vadd.f32 %v2510_v3, %v6210_v42  ;;  %v2732_v26 = vpack.c.bf16 %v2688_v38, %v2684_v54  ;;  %v2622_v42 = vadd.f32 %v2621_v32, %v2509_v37  ;;  %v6692_v38 = vld [vmem:[#allocation5_spill] sm:$0xff] }
 0x1ee   :  { %v2512_v20 = vpop.f32.mrf.mxu0  ;;  %v2412_v51 = vadd.f32 %v6228_v23, %v2299_v34 }
 0x1ef   :  { %v2625_v35 = vpop.f32.mrf.mxu1  ;;  %v2733_v43 = vpack.c.bf16 %v2689_v63, %v2685_v28  ;;  %v2513_v21 = vadd.f32 %v2512_v20, %v2400_v14  ;;  %v2624_v39 = vadd.f32 %v2623_v61, %v2511_v29  ;;  %v2692_v50 = vmax.f32 %v2622_v42, 0.0  ;;  %v6693_v28 = vld [vmem:[#allocation3_spill] sm:$0xff] }
 0x1f0   :  { %v2514_v40 = vpop.f32.mrf.mxu0 }
 0x1f1   :  { %v2627_v53 = vpop.f32.mrf.mxu1  ;;  %v2626_v22 = vadd.f32 %v2625_v35, %v2513_v21  ;;  %v2515_v15 = vadd.f32 %v2514_v40, %v2402_v52  ;;  %3327 = vmatprep.mubr.bf16.mxu1 %v2733_v43  ;;  %v2693_v49 = vmax.f32 %v2624_v39, 0.0 }
 0x1f2   :  { %v2518_v13 = vpop.f32.mrf.mxu0  ;;  %3328 = vmatmul.mubr.bf16.gmra.mxu1 %v2732_v26 }
 0x1f3   :  { %v2631_v60 = vpop.f32.mrf.mxu1  ;;  %v2628_v30 = vadd.f32 %v2627_v53, %v2515_v15  ;;  %v2696_v59 = vmax.f32 %v2626_v22, 0.0  ;;  %v2519_v58 = vadd.f32 %v2518_v13, %v6217_v56  ;;  %v6689_v56 = vld [vmem:[#allocation7_spill] sm:$0xff] }
 0x1f4   :  { %v2520_v45 = vpop.f32.mrf.mxu0  ;;  %v2309_v2 = vadd.f32 %v6689_v56, %v6130_v5 }
 0x1f5   :  { %v2633_v9 = vpop.f32.mrf.mxu1  ;;  %v2697_v17 = vmax.f32 %v2628_v30, 0.0  ;;  %v2521_v33 = vadd.f32 %v2520_v45, %v6224_v57  ;;  %v2736_v62 = vpack.c.bf16 %v2696_v59, %v2692_v50  ;;  %v2632_v57 = vadd.f32 %v2631_v60, %v2519_v58 }
 0x1f6   :  { %v2522_v31 = vpop.f32.mrf.mxu0  ;;  %v2422_v63 = vadd.f32 %v6693_v28, %v2309_v2 }
 0x1f7   :  { %v2635_v8 = vpop.f32.mrf.mxu1  ;;  %v2737_v55 = vpack.c.bf16 %v2697_v17, %v2693_v49  ;;  %v2523_v48 = vadd.f32 %v2522_v31, %v2410_v19  ;;  %v2634_v6 = vadd.f32 %v2633_v9, %v2521_v33  ;;  %v2700_v25 = vmax.f32 %v2632_v57, 0.0 }
 0x1f8   :  { %v2524_v44 = vpop.f32.mrf.mxu0 }
 0x1f9   :  { %v2637_v16 = vpop.f32.mrf.mxu1  ;;  %v2636_v47 = vadd.f32 %v2635_v8, %v2523_v48  ;;  %v2525_v7 = vadd.f32 %v2524_v44, %v2412_v51  ;;  %3337 = vmatprep.mubr.bf16.mxu1 %v2737_v55  ;;  %v2701_v32 = vmax.f32 %v2634_v6, 0.0  ;;  %v2810_v8 = vld [vmem:[%s6658_s4] sm:$0x3] }
 0x1fa   :  { %v2528_v1 = vpop.f32.mrf.mxu0  ;;  %3338 = vmatmul.mubr.bf16.gmra.mxu1 %v2736_v62  ;;  %v6694_v55 = vld [vmem:[#allocation2_spill] sm:$0xff] }
 0x1fb   :  { %v2641_v24 = vpop.f32.mrf.mxu1  ;;  %v2638_v23 = vadd.f32 %v2637_v16, %v2525_v7  ;;  %v2704_v0 = vmax.f32 %v2636_v47, 0.0  ;;  %v2529_v3 = vadd.f32 %v2528_v1, %v6692_v38  ;;  %v6695_v48 = vsub.s32 0, %v6694_v55 }
 0x1fc   :  { %v2530_v36 = vpop.f32.mrf.mxu0  ;;  %v6696_v44 = vsub.s32 1, %v6694_v55  ;;  %vm3485_vm0 = vcmp.lt.s32.totalorder %v6694_v55, 4 }
 0x1fd   :  { %v2643_v12 = vpop.f32.mrf.mxu1  ;;  %v2705_v46 = vmax.f32 %v2638_v23, 0.0  ;;  %v2531_v10 = vadd.f32 %v2530_v36, %v6691_v4  ;;  %v2740_v5 = vpack.c.bf16 %v2704_v0, %v2700_v25  ;;  %v2642_v43 = vadd.f32 %v2641_v24, %v2529_v3 }
 0x1fe   :  { %v2532_v61 = vpop.f32.mrf.mxu0  ;;  %v6323_v62 = vrot.slane %v2810_v8, %v6695_v48  ;;  %v6327_v16 = vrot.slane %v2810_v8, %v6696_v44 }
 0x1ff   :  { %v2645_v14 = vpop.f32.mrf.mxu1  ;;  %v2741_v29 = vpack.c.bf16 %v2705_v46, %v2701_v32  ;;  %v2533_v54 = vadd.f32 %v2532_v61, %v2420_v11  ;;  %v2644_v20 = vadd.f32 %v2643_v12, %v2531_v10  ;;  %v2708_v39 = vmax.f32 %v2642_v43, 0.0 }
 0x200   :  { %v2534_v37 = vpop.f32.mrf.mxu0 }
 0x201   :  { %v2646_v35 = vadd.f32 %v2645_v14, %v2533_v54  ;;  %v2535_v52 = vadd.f32 %v2534_v37, %v2422_v63  ;;  %3347 = vmatprep.mubr.bf16.mxu1 %v2741_v29  ;;  %v2647_v21 = vpop.f32.mrf.mxu1  ;;  %v2709_v53 = vmax.f32 %v2644_v20, 0.0 }
 0x202   :  { %3348 = vmatmul.mubr.bf16.gmra.mxu1 %v2740_v5 }
 0x203   :  { %v2648_v26 = vadd.f32 %v2647_v21, %v2535_v52  ;;  %v2712_v40 = vmax.f32 %v2646_v35, 0.0 }
 0x205   :  { %v2713_v41 = vmax.f32 %v2648_v26, 0.0  ;;  %v2744_v15 = vpack.c.bf16 %v2712_v40, %v2708_v39  ;;  %v6697_v39 = vlaneseq }
 0x207   :  { %v2745_v22 = vpack.c.bf16 %v2713_v41, %v2709_v53  ;;  %v3400_v41 = vld [vmem:[%s6660_s5] sm:$0xff] }
 0x209   :  { %3357 = vmatprep.mubr.bf16.mxu1 %v2745_v22  ;;  %v3484_v22 = vand.u32 127, %v6697_v39 }
 0x20a   :  { %3358 = vmatmul.mubr.bf16.gmra.mxu1 %v2744_v15 }
 0x20b   :  { %vm3501_vm1 = vcmp.lt.s32.totalorder %v3484_v22, 32 }
 0x20c   :  { %vm3502_vm2 = vmand %vm3485_vm0, %vm3501_vm1 }
 0x212   :  { %v3176_v42 = vpop.f32.mrf.mxu0 }
 0x213   :  { %v3177_v6 = vadd.f32 %v3176_v42, %v6323_v62 }
 0x214   :  { %v3178_v13 = vpop.f32.mrf.mxu0 }
 0x215   :  { %v3179_v7 = vadd.f32 %v3178_v13, %v6327_v16 }
 0x216   :  { %v3180_v60 = vpop.f32.mrf.mxu0 }
 0x217   :  { %v3181_v56 = vadd.f32 %v3180_v60, %v6323_v62 }
 0x218   :  { %v3182_v34 = vpop.f32.mrf.mxu0 }
 0x219   :  { %v3183_v0 = vadd.f32 %v3182_v34, %v6327_v16 }
 0x21a   :  { %v3186_v30 = vpop.f32.mrf.mxu0 }
 0x21b   :  { %v3187_v32 = vadd.f32 %v3186_v30, %v6323_v62 }
 0x21c   :  { %v3188_v59 = vpop.f32.mrf.mxu0 }
 0x21d   :  { %v3189_v10 = vadd.f32 %v3188_v59, %v6327_v16 }
 0x21e   :  { %v3190_v45 = vpop.f32.mrf.mxu0 }
 0x21f   :  { %v3191_v14 = vadd.f32 %v3190_v45, %v6323_v62 }
 0x220   :  { %v3192_v9 = vpop.f32.mrf.mxu0 }
 0x221   :  { %v3193_v29 = vadd.f32 %v3192_v9, %v6327_v16 }
 0x222   :  { %v3196_v19 = vpop.f32.mrf.mxu0 }
 0x223   :  { %v3197_v35 = vadd.f32 %v3196_v19, %v6323_v62 }
 0x224   :  { %v3198_v49 = vpop.f32.mrf.mxu0 }
 0x225   :  { %v3199_v21 = vadd.f32 %v3198_v49, %v6327_v16 }
 0x226   :  { %v3200_v17 = vpop.f32.mrf.mxu0 }
 0x227   :  { %v3201_v42 = vadd.f32 %v3200_v17, %v6323_v62 }
 0x228   :  { %v6308_v33 = vpop.f32.mrf.mxu0 }
 0x229   :  { %v3203_v34 = vadd.f32 %v6308_v33, %v6327_v16  ;;  %v3401_v33 = vld [vmem:[%s6660_s5 + $0x8] sm:$0xff] }
 0x22a   :  { %v6310_v50 = vpop.f32.mrf.mxu0 }
 0x22b   :  { %v3207_v17 = vadd.f32 %v6310_v50, %v6323_v62 }
 0x22c   :  { %v6312_v58 = vpop.f32.mrf.mxu0 }
 0x22e   :  { %v6314_v31 = vpop.f32.mrf.mxu0 }
 0x230   :  { %v6319_v51 = vpop.f32.mrf.mxu0 }
 0x231   :  { %v3213_v55 = vadd.f32 %v6319_v51, %v6327_v16  ;;  %v3403_v51 = vld [vmem:[%s6660_s5 + $0x18] sm:$0xff] }
 0x232   :  { %v6329_v27 = vpop.f32.mrf.mxu0 }
 0x234   :  { %v6335_v1 = vpop.f32.mrf.mxu0 }
 0x236   :  { %v6348_v18 = vpop.f32.mrf.mxu0 }
 0x238   :  { %v6358_v3 = vpop.f32.mrf.mxu0 }
 0x23a   :  { %v6368_v37 = vpop.f32.mrf.mxu0 }
 0x23c   :  { %v6378_v53 = vpop.f32.mrf.mxu0 }
 0x23e   :  { %v6400_v8 = vpop.f32.mrf.mxu0 }
 0x292   :  { %v3289_v47 = vpop.f32.mrf.mxu1 }
 0x293   :  { %v6333_v57 = vadd.f32 %v3289_v47, %v3177_v6 }
 0x294   :  { %v3291_v24 = vpop.f32.mrf.mxu1 }
 0x295   :  { %3652 = vst [vmem:[%s6659_s7] sm:$0xff] %v6333_v57  ;;  %v6342_v2 = vadd.f32 %v3291_v24, %v3179_v7  ;;  %v3534_v30 = vmul.f32 %v6333_v57, %v6333_v57  ;;  %v3209_v7 = vadd.f32 %v6312_v58, %v6327_v16  ;;  %v3402_v58 = vld [vmem:[%s6660_s5 + $0x10] sm:$0xff] }
 0x296   :  { %v3293_v23 = vpop.f32.mrf.mxu1 }
 0x297   :  { %v3368_v36 = vmul.f32 1.442695, %v6342_v2  ;;  %v6346_v12 = vadd.f32 %v3293_v23, %v3181_v56 }
 0x298   :  { %v3295_v11 = vpop.f32.mrf.mxu1 }
 0x299   :  { %4573 = vpow2.f32 %v3368_v36  ;;  %3653 = vst [vmem:[%s6659_s7 + $0x8] sm:$0xff] %v6346_v12  ;;  %v3296_v46 = vadd.f32 %v3295_v11, %v3183_v0  ;;  %v3211_v36 = vadd.f32 %v6314_v31, %v6323_v62  ;;  %v6424_v11 = vpop.f32.mrf.mxu0 }
 0x29a   :  { %v3299_v4 = vpop.f32.mrf.mxu1 }
 0x29b   :  { %v3370_v25 = vmul.f32 1.442695, %v3296_v46  ;;  %v6356_v38 = vadd.f32 %v3299_v4, %v3187_v32 }
 0x29c   :  { %v3301_v61 = vpop.f32.mrf.mxu1 }
 0x29d   :  { %4575 = vpow2.f32 %v3370_v25  ;;  %3654 = vst [vmem:[%s6659_s7 + $0x10] sm:$0xff] %v6356_v38  ;;  %v3302_v28 = vadd.f32 %v3301_v61, %v3189_v10 }
 0x29e   :  { %v3303_v63 = vpop.f32.mrf.mxu1 }
 0x29f   :  { %v3372_v54 = vmul.f32 1.442695, %v3302_v28  ;;  %v6366_v5 = vadd.f32 %v3303_v63, %v3191_v14  ;;  %v6447_v28 = vpop.f32.mrf.mxu0 }
 0x2a0   :  { %v3305_v20 = vpop.f32.mrf.mxu1 }
 0x2a1   :  { %4577 = vpow2.f32 %v3372_v54  ;;  %3655 = vst [vmem:[%s6659_s7 + $0x18] sm:$0xff] %v6366_v5  ;;  %v3306_v52 = vadd.f32 %v3305_v20, %v3193_v29  ;;  %v3217_v54 = vadd.f32 %v6329_v27, %v6323_v62  ;;  %v6469_v39 = vpop.f32.mrf.mxu0 }
 0x2a2   :  { %v3309_v43 = vpop.f32.mrf.mxu1 }
 0x2a3   :  { %v3374_v26 = vmul.f32 1.442695, %v3306_v52  ;;  %v6376_v40 = vadd.f32 %v3309_v43, %v3197_v35 }
 0x2a4   :  { %v3311_v15 = vpop.f32.mrf.mxu1 }
 0x2a5   :  { %4579 = vpow2.f32 %v3374_v26  ;;  %3656 = vst [vmem:[%s6659_s7 + $0x20] sm:$0xff] %v6376_v40  ;;  %v3312_v13 = vadd.f32 %v3311_v15, %v3199_v21  ;;  %v3219_v26 = vadd.f32 %v6335_v1, %v6327_v16  ;;  %v3404_v15 = vld [vmem:[%s6660_s5 + $0x20] sm:$0xff] }
 0x2a6   :  { %v4574_v60 = vpop.eup %4573  ;;  %v3313_v59 = vpop.f32.mrf.mxu1 }
 0x2a7   :  { %v3416_v45 = vmul.f32 %v4574_v60, %v3400_v41  ;;  %v3518_v9 = vmul.f32 %v4574_v60, %v4574_v60  ;;  %3668 = vst [vmem:[%s6661_s8] sm:$0xff] %v4574_v60  ;;  %v3376_v19 = vmul.f32 1.442695, %v3312_v13  ;;  %v6396_v49 = vadd.f32 %v3313_v59, %v3201_v42 }
 0x2a8   :  { %v3315_v48 = vpop.f32.mrf.mxu1  ;;  %v3221_v42 = vadd.f32 %v6348_v18, %v6323_v62 }
 0x2a9   :  { %v3432_v44 = vadd.f32 %v3416_v45, %v6333_v57  ;;  %v3550_v6 = vadd.f32 %v3534_v30, %v3518_v9  ;;  %4581 = vpow2.f32 %v3376_v19  ;;  %3657 = vst [vmem:[%s6659_s7 + $0x28] sm:$0xff] %v6396_v49  ;;  %v3316_v50 = vadd.f32 %v3315_v48, %v3203_v34  ;;  %v3240_v19 = vpop.f32.mrf.mxu0 }
 0x2aa   :  { %v4576_v47 = vpop.eup %4575  ;;  %v3319_v24 = vpop.f32.mrf.mxu1  ;;  %v3223_v45 = vadd.f32 %v6358_v3, %v6327_v16  ;;  %v3227_v3 = vadd.f32 %v6368_v37, %v6323_v62 }
 0x2ab   :  { %v3566_v56 = vsub.f32 %v3550_v6, %v6342_v2  ;;  %3636 = vst [vmem:[%s6662_s6] sm:$0xff] %v3432_v44  ;;  %v3417_v57 = vmul.f32 %v4576_v47, %v3401_v33  ;;  %3669 = vst [vmem:[%s6661_s8 + $0x8] sm:$0xff] %v4576_v47  ;;  %v3378_v23 = vmul.f32 1.442695, %v3316_v50  ;;  %v6420_v0 = vadd.f32 %v3319_v24, %v3207_v17  ;;  %v3405_v33 = vld [vmem:[%s6660_s5 + $0x28] sm:$0xff] }
 0x2ac   :  { %v3321_v2 = vpop.f32.mrf.mxu1  ;;  %v3229_v24 = vadd.f32 %v6378_v53, %v6327_v16  ;;  %v3406_v53 = vld [vmem:[%s6660_s5 + $0x30] sm:$0xff] }
 0x2ad   :  { %v4044_v32 = vadd.f32 -0.5, %v3566_v56  ;;  %v3433_v46 = vadd.f32 %v3417_v57, %v6346_v12  ;;  %4583 = vpow2.f32 %v3378_v23  ;;  %3658 = vst [vmem:[%s6659_s7 + $0x30] sm:$0xff] %v6420_v0  ;;  %v3322_v31 = vadd.f32 %v3321_v2, %v3209_v7  ;;  %v3242_v57 = vpop.f32.mrf.mxu0 }
 0x2ae   :  { %v4578_v4 = vpop.eup %4577  ;;  %v3323_v10 = vpop.f32.mrf.mxu1 }
 0x2af   :  { %v3598_v25 = vsel %vm3502_vm2, %v4044_v32, 0.0  ;;  %3637 = vst [vmem:[%s6662_s6 + $0x8] sm:$0xff] %v3433_v46  ;;  %v3418_v61 = vmul.f32 %v4578_v4, %v3402_v58  ;;  %3670 = vst [vmem:[%s6661_s8 + $0x10] sm:$0xff] %v4578_v4  ;;  %v3380_v12 = vmul.f32 1.442695, %v3322_v31  ;;  %v6445_v14 = vadd.f32 %v3323_v10, %v3211_v36  ;;  %v3407_v10 = vld [vmem:[%s6660_s5 + $0x38] sm:$0xff] }
 0x2b0   :  { %v3629_v63 = vrot.slane %v3598_v25, 4  ;;  %v3325_v29 = vpop.f32.mrf.mxu1  ;;  %v3231_v36 = vadd.f32 %v6400_v8, %v6323_v62  ;;  %v3233_v31 = vadd.f32 %v6424_v11, %v6327_v16  ;;  %v3237_v11 = vadd.f32 %v6447_v28, %v6323_v62 }
 0x2b1   :  { %v3434_v20 = vadd.f32 %v3418_v61, %v6356_v38  ;;  %4585 = vpow2.f32 %v3380_v12  ;;  %3659 = vst [vmem:[%s6659_s7 + $0x38] sm:$0xff] %v6445_v14  ;;  %v3326_v35 = vadd.f32 %v3325_v29, %v3213_v55  ;;  %v3246_v55 = vpop.f32.mrf.mxu0  ;;  %v3239_v29 = vadd.f32 %v6469_v39, %v6327_v16 }
 0x2b2   :  { %v4580_v52 = vpop.eup %4579  ;;  %v3630_v43 = vadd.f32 %v3629_v63, %v3598_v25  ;;  %v3329_v21 = vpop.f32.mrf.mxu1  ;;  %v3243_v39 = vadd.f32 %v3242_v57, %v6327_v16 }
 0x2b3   :  { %3638 = vst [vmem:[%s6662_s6 + $0x10] sm:$0xff] %v3434_v20  ;;  %v3419_v27 = vmul.f32 %v4580_v52, %v3403_v51  ;;  %3671 = vst [vmem:[%s6661_s8 + $0x18] sm:$0xff] %v4580_v52  ;;  %v3382_v38 = vmul.f32 1.442695, %v3326_v35  ;;  %v6467_v41 = vadd.f32 %v3329_v21, %v3217_v54  ;;  %v3248_v20 = vpop.f32.mrf.mxu0  ;;  %v3408_v35 = vld [vmem:[%s6660_s5 + $0x40] sm:$0xff] }
 0x2b4   :  { %v3631_v22 = vrot.slane %v3630_v43, 2  ;;  %v3331_v1 = vpop.f32.mrf.mxu1 }
 0x2b5   :  { %v3435_v13 = vadd.f32 %v3419_v27, %v6366_v5  ;;  %4587 = vpow2.f32 %v3382_v38  ;;  %3660 = vst [vmem:[%s6659_s7 + $0x40] sm:$0xff] %v6467_v41  ;;  %v3332_v60 = vadd.f32 %v3331_v1, %v3219_v26  ;;  %v3250_v1 = vpop.f32.mrf.mxu0 }
 0x2b6   :  { %v4582_v34 = vpop.eup %4581  ;;  %v3632_v30 = vadd.f32 %v3631_v22, %v3630_v43  ;;  %v3333_v59 = vpop.f32.mrf.mxu1  ;;  %v3241_v43 = vadd.f32 %v3240_v19, %v6323_v62 }
 0x2b7   :  { %3639 = vst [vmem:[%s6662_s6 + $0x18] sm:$0xff] %v3435_v13  ;;  %v3420_v18 = vmul.f32 %v4582_v34, %v3404_v15  ;;  %3672 = vst [vmem:[%s6661_s8 + $0x20] sm:$0xff] %v4582_v34  ;;  %v3384_v5 = vmul.f32 1.442695, %v3332_v60  ;;  %v6489_v9 = vadd.f32 %v3333_v59, %v3221_v42  ;;  %v3409_v42 = vld [vmem:[%s6660_s5 + $0x48] sm:$0xff]  ;;  %v3247_v60 = vadd.f32 %v3246_v55, %v6323_v62 }
 0x2b8   :  { %v3633_v17 = vrot.slane %v3632_v30, 1  ;;  %v3335_v48 = vpop.f32.mrf.mxu1 }
 0x2b9   :  { %v3436_v44 = vadd.f32 %v3420_v18, %v6376_v40  ;;  %4589 = vpow2.f32 %v3384_v5  ;;  %3661 = vst [vmem:[%s6659_s7 + $0x48] sm:$0xff] %v6489_v9  ;;  %v3336_v6 = vadd.f32 %v3335_v48, %v3223_v45  ;;  %v3249_v18 = vadd.f32 %v3248_v20, %v6327_v16 }
 0x2ba   :  { %v4584_v50 = vpop.eup %4583  ;;  %v3634_v47 = vadd.f32 %v3633_v17, %v3632_v30  ;;  %v3339_v7 = vpop.f32.mrf.mxu1 }
 0x2bb   :  { %3640 = vst [vmem:[%s6662_s6 + $0x20] sm:$0xff] %v3436_v44  ;;  %v3421_v37 = vmul.f32 %v4584_v50, %v3405_v33  ;;  %3673 = vst [vmem:[%s6661_s8 + $0x28] sm:$0xff] %v4584_v50  ;;  %v3386_v40 = vmul.f32 1.442695, %v3336_v6  ;;  %v6509_v56 = vadd.f32 %v3339_v7, %v3227_v3  ;;  %v3252_v17 = vpop.f32.mrf.mxu0  ;;  %v3410_v33 = vld [vmem:[%s6660_s5 + $0x50] sm:$0xff]  ;;  %v3251_v3 = vadd.f32 %v3250_v1, %v6323_v62 }
 0x2bc   :  { %3635 = vst [vmem:[%s6663_s9] sm:$0x1] %v3634_v47  ;;  %v3341_v23 = vpop.f32.mrf.mxu1  ;;  %v3253_v7 = vadd.f32 %v3252_v17, %v6327_v16 }
 0x2bd   :  { %v3437_v58 = vadd.f32 %v3421_v37, %v6396_v49  ;;  %4591 = vpow2.f32 %v3386_v40  ;;  %3662 = vst [vmem:[%s6659_s7 + $0x50] sm:$0xff] %v6509_v56  ;;  %v3342_v2 = vadd.f32 %v3341_v23, %v3229_v24  ;;  %v3411_v37 = vld [vmem:[%s6660_s5 + $0x58] sm:$0xff] }
 0x2be   :  { %v4586_v32 = vpop.eup %4585  ;;  %v3343_v46 = vpop.f32.mrf.mxu1 }
 0x2bf   :  { %3641 = vst [vmem:[%s6662_s6 + $0x28] sm:$0xff] %v3437_v58  ;;  %v3422_v4 = vmul.f32 %v4586_v32, %v3406_v53  ;;  %3674 = vst [vmem:[%s6661_s8 + $0x30] sm:$0xff] %v4586_v32  ;;  %v3388_v49 = vmul.f32 1.442695, %v3342_v2  ;;  %v6532_v8 = vadd.f32 %v3343_v46, %v3231_v36  ;;  %v3413_v46 = vld [vmem:[%s6660_s5 + $0x68] sm:$0xff] }
 0x2c0   :  { %v3345_v25 = vpop.f32.mrf.mxu1 }
 0x2c1   :  { %v3438_v61 = vadd.f32 %v3422_v4, %v6420_v0  ;;  %4593 = vpow2.f32 %v3388_v49  ;;  %3663 = vst [vmem:[%s6659_s7 + $0x58] sm:$0xff] %v6532_v8  ;;  %v3346_v12 = vadd.f32 %v3345_v25, %v3233_v31 }
 0x2c2   :  { %v4588_v63 = vpop.eup %4587  ;;  %v3349_v51 = vpop.f32.mrf.mxu1 }
 0x2c3   :  { %3642 = vst [vmem:[%s6662_s6 + $0x30] sm:$0xff] %v3438_v61  ;;  %v3423_v54 = vmul.f32 %v4588_v63, %v3407_v10  ;;  %3675 = vst [vmem:[%s6661_s8 + $0x38] sm:$0xff] %v4588_v63  ;;  %v3390_v0 = vmul.f32 1.442695, %v3346_v12  ;;  %v6552_v28 = vadd.f32 %v3349_v51, %v3237_v11  ;;  %v3415_v11 = vld [vmem:[%s6660_s5 + $0x78] sm:$0xff] }
 0x2c4   :  { %v3351_v52 = vpop.f32.mrf.mxu1 }
 0x2c5   :  { %v3439_v21 = vadd.f32 %v3423_v54, %v6445_v14  ;;  %4595 = vpow2.f32 %v3390_v0  ;;  %3664 = vst [vmem:[%s6659_s7 + $0x60] sm:$0xff] %v6552_v28  ;;  %v3352_v26 = vadd.f32 %v3351_v52, %v3239_v29 }
 0x2c6   :  { %v4590_v27 = vpop.eup %4589  ;;  %v3353_v38 = vpop.f32.mrf.mxu1 }
 0x2c7   :  { %3643 = vst [vmem:[%s6662_s6 + $0x38] sm:$0xff] %v3439_v21  ;;  %v3424_v22 = vmul.f32 %v4590_v27, %v3408_v35  ;;  %3676 = vst [vmem:[%s6661_s8 + $0x40] sm:$0xff] %v4590_v27  ;;  %v3392_v14 = vmul.f32 1.442695, %v3352_v26  ;;  %v3354_v15 = vadd.f32 %v3353_v38, %v3241_v43 }
 0x2c8   :  { %v3355_v13 = vpop.f32.mrf.mxu1 }
 0x2c9   :  { %v3440_v34 = vadd.f32 %v3424_v22, %v6467_v41  ;;  %4597 = vpow2.f32 %v3392_v14  ;;  %3665 = vst [vmem:[%s6659_s7 + $0x68] sm:$0xff] %v3354_v15  ;;  %v3356_v30 = vadd.f32 %v3355_v13, %v3243_v39 }
 0x2ca   :  { %v4592_v59 = vpop.eup %4591  ;;  %v3359_v45 = vpop.f32.mrf.mxu1 }
 0x2cb   :  { %3644 = vst [vmem:[%s6662_s6 + $0x40] sm:$0xff] %v3440_v34  ;;  %v3425_v5 = vmul.f32 %v4592_v59, %v3409_v42  ;;  %3677 = vst [vmem:[%s6661_s8 + $0x48] sm:$0xff] %v4592_v59  ;;  %v3394_v41 = vmul.f32 1.442695, %v3356_v30  ;;  %v3360_v19 = vadd.f32 %v3359_v45, %v3247_v60 }
 0x2cc   :  { %v3361_v48 = vpop.f32.mrf.mxu1 }
 0x2cd   :  { %v3441_v44 = vadd.f32 %v3425_v5, %v6489_v9  ;;  %4599 = vpow2.f32 %v3394_v41  ;;  %3666 = vst [vmem:[%s6659_s7 + $0x70] sm:$0xff] %v3360_v19  ;;  %v3362_v6 = vadd.f32 %v3361_v48, %v3249_v18 }
 0x2ce   :  { %v4594_v50 = vpop.eup %4593  ;;  %v3363_v47 = vpop.f32.mrf.mxu1 }
 0x2cf   :  { %3645 = vst [vmem:[%s6662_s6 + $0x48] sm:$0xff] %v3441_v44  ;;  %v3426_v24 = vmul.f32 %v4594_v50, %v3410_v33  ;;  %3678 = vst [vmem:[%s6661_s8 + $0x50] sm:$0xff] %v4594_v50  ;;  %v3396_v62 = vmul.f32 1.442695, %v3362_v6  ;;  %v3364_v9 = vadd.f32 %v3363_v47, %v3251_v3 }
 0x2d0   :  { %v3365_v40 = vpop.f32.mrf.mxu1 }
 0x2d1   :  { %v3442_v57 = vadd.f32 %v3426_v24, %v6509_v56  ;;  %4601 = vpow2.f32 %v3396_v62  ;;  %3667 = vst [vmem:[%s6659_s7 + $0x78] sm:$0xff] %v3364_v9  ;;  %v3366_v16 = vadd.f32 %v3365_v40, %v3253_v7  ;;  %v3412_v56 = vld [vmem:[%s6660_s5 + $0x60] sm:$0xff] }
 0x2d2   :  { %v4596_v53 = vpop.eup %4595 }
 0x2d3   :  { %3646 = vst [vmem:[%s6662_s6 + $0x50] sm:$0xff] %v3442_v57  ;;  %v3427_v23 = vmul.f32 %v4596_v53, %v3411_v37  ;;  %3679 = vst [vmem:[%s6661_s8 + $0x58] sm:$0xff] %v4596_v53  ;;  %v3398_v36 = vmul.f32 1.442695, %v3366_v16 }
 0x2d5   :  { %v3443_v58 = vadd.f32 %v3427_v23, %v6532_v8  ;;  %4603 = vpow2.f32 %v3398_v36  ;;  %v3414_v8 = vld [vmem:[%s6660_s5 + $0x70] sm:$0xff] }
 0x2d6   :  { %v4598_v2 = vpop.eup %4597 }
 0x2d7   :  { %3647 = vst [vmem:[%s6662_s6 + $0x58] sm:$0xff] %v3443_v58  ;;  %v3428_v32 = vmul.f32 %v4598_v2, %v3412_v56  ;;  %3680 = vst [vmem:[%s6661_s8 + $0x60] sm:$0xff] %v4598_v2 }
 0x2d9   :  { %v3444_v31 = vadd.f32 %v3428_v32, %v6552_v28 }
 0x2da   :  { %v4600_v4 = vpop.eup %4599 }
 0x2db   :  { %3648 = vst [vmem:[%s6662_s6 + $0x60] sm:$0xff] %v3444_v31  ;;  %v3429_v49 = vmul.f32 %v4600_v4, %v3413_v46  ;;  %3681 = vst [vmem:[%s6661_s8 + $0x68] sm:$0xff] %v4600_v4 }
 0x2dd   :  { %v3445_v55 = vadd.f32 %v3429_v49, %v3354_v15 }
 0x2de   :  { %v4602_v10 = vpop.eup %4601 }
 0x2df   :  { %3649 = vst [vmem:[%s6662_s6 + $0x68] sm:$0xff] %v3445_v55  ;;  %v3430_v25 = vmul.f32 %v4602_v10, %v3414_v8  ;;  %3682 = vst [vmem:[%s6661_s8 + $0x70] sm:$0xff] %v4602_v10 }
 0x2e1   :  { %v3446_v61 = vadd.f32 %v3430_v25, %v3360_v19 }
 0x2e2   :  { %v4604_v12 = vpop.eup %4603 }
 0x2e3   :  { %3650 = vst [vmem:[%s6662_s6 + $0x70] sm:$0xff] %v3446_v61  ;;  %v3431_v63 = vmul.f32 %v4604_v12, %v3415_v11  ;;  %3683 = vst [vmem:[%s6661_s8 + $0x78] sm:$0xff] %v4604_v12 }
 0x2e5   :  { %v3447_v51 = vadd.f32 %v3431_v63, %v3364_v9 }
 0x2e7   :  { %3651 = vst [vmem:[%s6662_s6 + $0x78] sm:$0xff] %v3447_v51 }

</bundles_post_ra>
